<compile_context>
chip_gen: v7x
topology: tpu7x:2x2x1
jax: 0.10.0
libtpu: 0.0.40
codegen_flags: <defaults>
</compile_context>

<pallas_src>
import math

import jax
import jax.numpy as jnp
from jax.experimental import pallas as pl
from jax.experimental.pallas import tpu as pltpu


def _choose_graphs_per_block(batch, n_agent, target_rows=1024):
    """Pick graphs-per-grid-step.  G is a multiple of 8 so in-kernel sublane
    slices / concats are aligned and tile_rows = G*n_agent is a multiple of 8.
    Prefers an even number of grid blocks (v7x has 2 TensorCores)."""
    g = max(8, (target_rows // max(n_agent, 1)) // 8 * 8)
    if g >= batch:
        return math.ceil(batch / 8) * 8            # single (padded) block
    n_blocks = math.ceil(batch / g)
    if n_blocks > 1 and n_blocks % 2 == 1:         # prefer an even block count
        g_alt = math.ceil(math.ceil(batch / (n_blocks + 1)) / 8) * 8
        if g_alt >= 8 and math.ceil(batch / g_alt) % 2 == 0:
            g = g_alt
    return g


def _build_kernel(n_gcn_layers, n_agent, graphs_per_block, gcn_hidden_size):
    """Kernel closure; layer count / agents-per-graph / graphs-per-tile are static."""
    G = graphs_per_block
    hidden = gcn_hidden_size
    inv_n = 1.0 / n_agent

    def kernel(obs_ref, w_in_ref, b_in_ref, *rest):
        gcn_refs = rest[: 2 * n_gcn_layers]
        (w_post_ref, b_post_ref, w1g_ref, w1l_ref, b1_ref,
         w2_ref, b2_ref, w3_ref, b3_ref, q_ref) = rest[2 * n_gcn_layers:]

        f32 = jnp.float32
        relu = lambda v: jnp.maximum(v, 0.0)

        def dense(x, w_ref, b_ref):
            # MXU operands in the (possibly bf16) weight dtype, f32 accumulation,
            # bias-add / ReLU in f32 (v5e VPU has no bf16).
            return (jnp.dot(x.astype(w_ref.dtype), w_ref[...],
                            preferred_element_type=f32) + b_ref[...])

        # Fused pre_gcn_fc + local_encode_fc: one obs matmul, lane-slice the result.
        y = relu(dense(obs_ref[...], w_in_ref, b_in_ref))     # [R, hidden+local_enc]
        h = y[:, :hidden]                                      # pre-GCN node features
        loc = y[:, hidden:]                                    # local encoding

        # Rows are agent-major within the block (wrapper permutation), so the
        # fully-connected GCN aggregation (== per-graph mean) is n_agent aligned
        # sublane slices + adds: no adjacency, no mask matmul, no iota.
        m = h[0:G, :]
        for k in range(1, n_agent):
            m = m + h[k * G:(k + 1) * G, :]
        m = m * f32(inv_n)                                     # [G, hidden]

        # After the first aggregation all agent rows of a graph are identical, so
        # the GCN stack + mean pool collapse to per-graph compute.
        for l in range(n_gcn_layers):
            m = relu(dense(m, gcn_refs[2 * l], gcn_refs[2 * l + 1]))

        g = relu(dense(m, w_post_ref, b_post_ref))             # [G, global_enc]

        # fc1 over concat(repeat_interleave(global), local):
        #   x = relu(repeat(g @ W1g) + loc @ W1l + b1)
        # Global branch computed per graph (n_agent x fewer FLOPs); the repeat is a
        # sublane concatenate of aligned [G, fc1] blocks (agent-major layout).
        yg = jnp.dot(g.astype(w1g_ref.dtype), w1g_ref[...],
                     preferred_element_type=f32)               # [G, fc1]
        yl = jnp.dot(loc.astype(w1l_ref.dtype), w1l_ref[...],
                     preferred_element_type=f32)               # [R, fc1]
        if n_agent > 1:
            yg = jnp.concatenate([yg] * n_agent, axis=0)       # repeat_interleave
        x = relu(yg + yl + b1_ref[...])

        x = relu(dense(x, w2_ref, b2_ref))
        q_ref[...] = dense(x, w3_ref, b3_ref)                  # [R, n_action]

    return kernel


def critic_gcn_forward(obs_j, params, *, n_agent, n_action,
                       param_dtype=jnp.bfloat16, graphs_per_block=None):
    obs_size, hidden = params["w_pre"].shape
    local_enc = params["w_loc"].shape[1]
    global_enc = params["w_post"].shape[1]
    fc1_size = params["w1"].shape[1]
    fc2_size = params["w2"].shape[1]
    n_layers = len(params["gcn"])

    obs = obs_j.reshape(-1, obs_size)
    n_nodes = obs.shape[0]
    assert n_nodes % n_agent == 0
    batch = n_nodes // n_agent

    G = graphs_per_block if graphs_per_block is not None else \
        _choose_graphs_per_block(batch, n_agent)
    padded_batch = math.ceil(batch / G) * G
    num_blocks = padded_batch // G
    tile_rows = G * n_agent
    n_rows = padded_batch * n_agent
    if num_blocks > 1:
        assert tile_rows % 8 == 0, "tile rows must be a multiple of 8"

    # Stream obs in the matmul dtype (halves input DMA for bf16) and permute each
    # block of G graphs to agent-major row order so the in-kernel per-graph mean /
    # repeat_interleave become aligned sublane ops (no mask matmuls).
    obs = obs.astype(param_dtype)
    if n_rows != n_nodes:
        obs = jnp.pad(obs, ((0, n_rows - n_nodes), (0, 0)))
    obs = (obs.reshape(num_blocks, G, n_agent, obs_size)
              .transpose(0, 2, 1, 3)
              .reshape(n_rows, obs_size))

    cast_w = lambda w: w.astype(param_dtype)          # matmul operands
    cast_b = lambda b: b.astype(jnp.float32)          # biases / VPU math stay f32

    # pre_gcn_fc + local_encode_fc fused into one [obs_size, hidden+local] matmul.
    w_in = jnp.concatenate([params["w_pre"], params["w_loc"]], axis=1)
    b_in = jnp.concatenate([params["b_pre"], params["b_loc"]], axis=1)
    w1g = params["w1"][:global_enc]                   # fc1 global branch (per graph)
    w1l = params["w1"][global_enc:]                   # fc1 local branch (per node)
    gcn_flat = []
    for (w, b) in params["gcn"]:
        gcn_flat += [cast_w(w), cast_b(b)]
    weights = [cast_w(w_in), cast_b(b_in), *gcn_flat,
               cast_w(params["w_post"]), cast_b(params["b_post"]),
               cast_w(w1g), cast_w(w1l), cast_b(params["b1"]),
               cast_w(params["w2"]), cast_b(params["b2"]),
               cast_w(params["w3"]), cast_b(params["b3"])]
    weight_bytes = sum(int(w.size) * w.dtype.itemsize for w in weights)

    # Generation-aware VMEM budget: resident weights (2x margin in case single
    # buffering is unavailable) + streamed io + activations, clamped 8 MiB below
    # the physical capacity (64 MiB v7x, 128 MiB v5e/v6e).
    io_bytes = 2 * tile_rows * (obs_size * obs.dtype.itemsize + n_action * 4)
    act_bytes = 4 * tile_rows * ((hidden + local_enc) + 3 * fc1_size + fc2_size + 128)
    vmem_need = 2 * weight_bytes + io_bytes + 2 * act_bytes + (8 << 20)
    try:
        vmem_cap = int(pltpu.get_tpu_info().vmem_capacity_bytes)
    except Exception:
        vmem_cap = 64 << 20                           # conservative: v7x physical
    vmem_limit = int(min(max(vmem_need, 32 << 20), vmem_cap - (8 << 20)))

    flops = 2 * n_rows * (obs_size * (hidden + local_enc) + local_enc * fc1_size
                          + fc1_size * fc2_size + fc2_size * n_action)
    flops += 2 * padded_batch * (n_layers * hidden * hidden
                                 + hidden * global_enc + global_enc * fc1_size)
    bytes_accessed = int(obs.size * obs.dtype.itemsize
                         + n_rows * n_action * 4 + weight_bytes)
    cost = pl.CostEstimate(flops=int(flops), transcendentals=0,
                           bytes_accessed=bytes_accessed)

    obs_spec = pl.BlockSpec((tile_rows, obs_size), lambda i: (i, 0))
    out_spec = pl.BlockSpec((tile_rows, n_action), lambda i: (i, 0))
    kernel = _build_kernel(n_layers, n_agent, G, hidden)

    def run(single_buffer_weights):
        if single_buffer_weights:
            # Grid-invariant inputs don't need double buffering; single-buffering
            # halves resident weight VMEM (matters on v7x's 64 MiB at large fc sizes).
            w_specs = [pl.BlockSpec(w.shape, lambda i: (0, 0),
                                    pipeline_mode=pl.Buffered(1)) for w in weights]
        else:
            w_specs = [pl.BlockSpec(w.shape, lambda i: (0, 0)) for w in weights]
        return pl.pallas_call(
            kernel,
            out_shape=jax.ShapeDtypeStruct((n_rows, n_action), jnp.float32),
            grid=(num_blocks,),
            in_specs=[obs_spec, *w_specs],
            out_specs=out_spec,
            compiler_params=pltpu.CompilerParams(
                # "parallel" lets Mosaic shard the graph-block axis across both
                # v7x TensorCores; no effect on single-TC v5e/v6e.
                dimension_semantics=("parallel",),
                vmem_limit_bytes=vmem_limit),
            cost_estimate=cost,
        )(obs, *weights)

    try:
        q = jax.block_until_ready(run(True))
    except Exception:
        # pl.Buffered(1) not supported by this jax/Mosaic -> default buffering.
        q = run(False)

    # Undo the per-block agent-major permutation and strip padding.
    q = (q.reshape(num_blocks, n_agent, G, n_action)
          .transpose(0, 2, 1, 3)
          .reshape(n_rows, n_action))[:n_nodes]
    return q.reshape(batch, n_agent, n_action)


def init_params(key, *, obs_size, n_agent, n_action, gcn_n_layer,
                gcn_hidden_size, global_encode_size, local_encode_size,
                fc1_size, fc2_size):
    def linear(k, fan_in, fan_out):
        kw, kb = jax.random.split(k)
        w = jax.random.normal(kw, (fan_in, fan_out), jnp.float32) / jnp.sqrt(fan_in)
        b = 0.01 * jax.random.normal(kb, (1, fan_out), jnp.float32)
        return w, b

    keys = jax.random.split(key, 6 + gcn_n_layer)
    w_pre, b_pre = linear(keys[0], obs_size, gcn_hidden_size)
    gcn = [linear(keys[1 + l], gcn_hidden_size, gcn_hidden_size)
           for l in range(gcn_n_layer)]
    w_post, b_post = linear(keys[1 + gcn_n_layer], gcn_hidden_size, global_encode_size)
    w_loc, b_loc = linear(keys[2 + gcn_n_layer], obs_size, local_encode_size)
    w1, b1 = linear(keys[3 + gcn_n_layer],
                    global_encode_size + local_encode_size, fc1_size)
    w2, b2 = linear(keys[4 + gcn_n_layer], fc1_size, fc2_size)
    w3, b3 = linear(keys[5 + gcn_n_layer], fc2_size, n_action)
    return {"w_pre": w_pre, "b_pre": b_pre, "gcn": gcn,
            "w_post": w_post, "b_post": b_post,
            "w_loc": w_loc, "b_loc": b_loc,
            "w1": w1, "b1": b1, "w2": w2, "b2": b2, "w3": w3, "b3": b3}


def reference_forward(obs_j, params, *, n_agent, n_action):
    """Pure-JAX reference mirroring the PyTorch forward pass (explicit A_hat)."""
    obs_size = params["w_pre"].shape[0]
    obs = obs_j.reshape(-1, obs_size).astype(jnp.float32)
    batch = obs.shape[0] // n_agent
    relu = lambda v: jnp.maximum(v, 0.0)

    h = relu(obs @ params["w_pre"] + params["b_pre"])
    h = h.reshape(batch, n_agent, -1)
    a_graph = jnp.full((n_agent, n_agent), 1.0 / n_agent, jnp.float32)
    for (w, b) in params["gcn"]:
        h = relu(jnp.einsum("ij,bjk->bik", a_graph, h) @ w + b)
    g = h.mean(axis=1)
    g = relu(g @ params["w_post"] + params["b_post"])
    loc = relu(obs @ params["w_loc"] + params["b_loc"])
    g_rep = jnp.repeat(g, n_agent, axis=0)
    x = jnp.concatenate([g_rep, loc], axis=1)
    x = relu(x @ params["w1"] + params["b1"])
    x = relu(x @ params["w2"] + params["b2"])
    q = x @ params["w3"] + params["b3"]
    return q.reshape(batch, n_agent, n_action)


if __name__ == "__main__":
    # Small, module-consistent shapes.
    batch = 2
    n_agent = 4
    obs_size = 32
    n_action = 8
    gcn_n_layer = 2
    gcn_hidden_size = 32
    global_encode_size = 32
    local_encode_size = 32
    fc1_size = 64
    fc2_size = 64

    key = jax.random.PRNGKey(0)
    k_param, k_obs, k_obs2 = jax.random.split(key, 3)
    params = init_params(
        k_param, obs_size=obs_size, n_agent=n_agent, n_action=n_action,
        gcn_n_layer=gcn_n_layer, gcn_hidden_size=gcn_hidden_size,
        global_encode_size=global_encode_size, local_encode_size=local_encode_size,
        fc1_size=fc1_size, fc2_size=fc2_size)

    # Test 1: tiny batch, auto tile (single padded block), f32 weights -> tight tol.
    obs_j = jax.random.normal(k_obs, (batch, n_agent, obs_size), jnp.float32)
    q = critic_gcn_forward(obs_j, params, n_agent=n_agent, n_action=n_action,
                           param_dtype=jnp.float32)
    q = jax.block_until_ready(q)
    q_ref = reference_forward(obs_j, params, n_agent=n_agent, n_action=n_action)
    assert q.shape == (batch, n_agent, n_action)
    assert jnp.allclose(q, q_ref, atol=1e-4, rtol=1e-4), \
        f"max abs err = {jnp.max(jnp.abs(q - q_ref))}"

    # Test 2: multi-block grid (resident weights, parallel axis), f32 weights.
    batch2 = 40
    obs_j2 = jax.random.normal(k_obs2, (batch2, n_agent, obs_size), jnp.float32)
    q2 = critic_gcn_forward(obs_j2, params, n_agent=n_agent, n_action=n_action,
                            param_dtype=jnp.float32, graphs_per_block=8)
    q2 = jax.block_until_ready(q2)
    q2_ref = reference_forward(obs_j2, params, n_agent=n_agent, n_action=n_action)
    assert jnp.allclose(q2, q2_ref, atol=1e-4, rtol=1e-4), \
        f"max abs err = {jnp.max(jnp.abs(q2 - q2_ref))}"

    # Test 3: default bf16 weights / streamed obs (v6e/v7x recommendation) -> loose tol.
    q3 = critic_gcn_forward(obs_j2, params, n_agent=n_agent, n_action=n_action)
    q3 = jax.block_until_ready(q3)
    assert jnp.allclose(q3, q2_ref, atol=5e-2, rtol=5e-2), \
        f"bf16 max abs err = {jnp.max(jnp.abs(q3 - q2_ref))}"

    print("KERNEL_OK")
</pallas_src>

<mosaic_0001>
module attributes {stable_mosaic.version = 11 : i64} {
  func.func @kernel(%arg0: i32, %arg1: memref<32x32xf32, #tpu.memory_space<vmem>>, %arg2: memref<32x64xf32, #tpu.memory_space<vmem>>, %arg3: memref<1x64xf32, #tpu.memory_space<vmem>>, %arg4: memref<32x32xf32, #tpu.memory_space<vmem>>, %arg5: memref<1x32xf32, #tpu.memory_space<vmem>>, %arg6: memref<32x32xf32, #tpu.memory_space<vmem>>, %arg7: memref<1x32xf32, #tpu.memory_space<vmem>>, %arg8: memref<32x32xf32, #tpu.memory_space<vmem>>, %arg9: memref<1x32xf32, #tpu.memory_space<vmem>>, %arg10: memref<32x64xf32, #tpu.memory_space<vmem>>, %arg11: memref<32x64xf32, #tpu.memory_space<vmem>>, %arg12: memref<1x64xf32, #tpu.memory_space<vmem>>, %arg13: memref<64x64xf32, #tpu.memory_space<vmem>>, %arg14: memref<1x64xf32, #tpu.memory_space<vmem>>, %arg15: memref<64x8xf32, #tpu.memory_space<vmem>>, %arg16: memref<1x8xf32, #tpu.memory_space<vmem>>, %arg17: memref<32x8xf32, #tpu.memory_space<vmem>>) attributes {dimension_semantics = [#tpu.dimension_semantics<parallel>], iteration_bounds = array<i64: 1>, scalar_prefetch = 0 : i64, scratch_operands = 0 : i64, tpu.core_type = #tpu.core_type<tc>, window_params = [{transform_indices = @transform_0, window_bounds = array<i64: 32, 32>}, {pipeline_mode = #tpu.pipeline_mode<synchronous>, transform_indices = @transform_1, window_bounds = array<i64: 32, 64>}, {pipeline_mode = #tpu.pipeline_mode<synchronous>, transform_indices = @transform_2, window_bounds = array<i64: 1, 64>}, {pipeline_mode = #tpu.pipeline_mode<synchronous>, transform_indices = @transform_3, window_bounds = array<i64: 32, 32>}, {pipeline_mode = #tpu.pipeline_mode<synchronous>, transform_indices = @transform_4, window_bounds = array<i64: 1, 32>}, {pipeline_mode = #tpu.pipeline_mode<synchronous>, transform_indices = @transform_5, window_bounds = array<i64: 32, 32>}, {pipeline_mode = #tpu.pipeline_mode<synchronous>, transform_indices = @transform_6, window_bounds = array<i64: 1, 32>}, {pipeline_mode = #tpu.pipeline_mode<synchronous>, transform_indices = @transform_7, window_bounds = array<i64: 32, 32>}, {pipeline_mode = #tpu.pipeline_mode<synchronous>, transform_indices = @transform_8, window_bounds = array<i64: 1, 32>}, {pipeline_mode = #tpu.pipeline_mode<synchronous>, transform_indices = @transform_9, window_bounds = array<i64: 32, 64>}, {pipeline_mode = #tpu.pipeline_mode<synchronous>, transform_indices = @transform_10, window_bounds = array<i64: 32, 64>}, {pipeline_mode = #tpu.pipeline_mode<synchronous>, transform_indices = @transform_11, window_bounds = array<i64: 1, 64>}, {pipeline_mode = #tpu.pipeline_mode<synchronous>, transform_indices = @transform_12, window_bounds = array<i64: 64, 64>}, {pipeline_mode = #tpu.pipeline_mode<synchronous>, transform_indices = @transform_13, window_bounds = array<i64: 1, 64>}, {pipeline_mode = #tpu.pipeline_mode<synchronous>, transform_indices = @transform_14, window_bounds = array<i64: 64, 8>}, {pipeline_mode = #tpu.pipeline_mode<synchronous>, transform_indices = @transform_15, window_bounds = array<i64: 1, 8>}, {transform_indices = @transform_16, window_bounds = array<i64: 32, 8>}]} {
    %c0 = arith.constant 0 : index
    %c0_0 = arith.constant 0 : index
    %0 = vector.load %arg1[%c0, %c0_0] : memref<32x32xf32, #tpu.memory_space<vmem>>, vector<32x32xf32>
    %c0_1 = arith.constant 0 : index
    %c0_2 = arith.constant 0 : index
    %1 = vector.load %arg2[%c0_1, %c0_2] : memref<32x64xf32, #tpu.memory_space<vmem>>, vector<32x64xf32>
    %cst = arith.constant dense<0.000000e+00> : vector<32x64xf32>
    %2 = tpu.matmul %0, %1, %cst {dimension_numbers = #tpu.dot_dimension_numbers<[1], [0], [0], [1], [0, 0, 1, 1], [], []>} : vector<32x32xf32>, vector<32x64xf32>, vector<32x64xf32> -> vector<32x64xf32>
    %c0_3 = arith.constant 0 : index
    %c0_4 = arith.constant 0 : index
    %3 = vector.load %arg3[%c0_3, %c0_4] : memref<1x64xf32, #tpu.memory_space<vmem>>, vector<1x64xf32>
    %4 = vector.broadcast %3 : vector<1x64xf32> to vector<32x64xf32>
    %5 = arith.addf %2, %4 : vector<32x64xf32>
    %cst_5 = arith.constant 0.000000e+00 : f32
    %6 = vector.broadcast %cst_5 : f32 to vector<32x64xf32>
    %7 = arith.maximumf %5, %6 : vector<32x64xf32>
    %8 = vector.extract_strided_slice %7 {offsets = [0, 0], sizes = [32, 32], strides = [1, 1]} : vector<32x64xf32> to vector<32x32xf32>
    %9 = vector.extract_strided_slice %7 {offsets = [0, 32], sizes = [32, 32], strides = [1, 1]} : vector<32x64xf32> to vector<32x32xf32>
    %10 = vector.extract_strided_slice %8 {offsets = [0, 0], sizes = [8, 32], strides = [1, 1]} : vector<32x32xf32> to vector<8x32xf32>
    %11 = vector.extract_strided_slice %8 {offsets = [8, 0], sizes = [8, 32], strides = [1, 1]} : vector<32x32xf32> to vector<8x32xf32>
    %12 = arith.addf %10, %11 : vector<8x32xf32>
    %13 = vector.extract_strided_slice %8 {offsets = [16, 0], sizes = [8, 32], strides = [1, 1]} : vector<32x32xf32> to vector<8x32xf32>
    %14 = arith.addf %12, %13 : vector<8x32xf32>
    %15 = vector.extract_strided_slice %8 {offsets = [24, 0], sizes = [8, 32], strides = [1, 1]} : vector<32x32xf32> to vector<8x32xf32>
    %16 = arith.addf %14, %15 : vector<8x32xf32>
    %cst_6 = arith.constant 2.500000e-01 : f32
    %17 = vector.broadcast %cst_6 : f32 to vector<8x32xf32>
    %18 = arith.mulf %16, %17 : vector<8x32xf32>
    %c0_7 = arith.constant 0 : index
    %c0_8 = arith.constant 0 : index
    %19 = vector.load %arg4[%c0_7, %c0_8] : memref<32x32xf32, #tpu.memory_space<vmem>>, vector<32x32xf32>
    %cst_9 = arith.constant dense<0.000000e+00> : vector<8x32xf32>
    %20 = tpu.matmul %18, %19, %cst_9 {dimension_numbers = #tpu.dot_dimension_numbers<[1], [0], [0], [1], [0, 0, 1, 1], [], []>} : vector<8x32xf32>, vector<32x32xf32>, vector<8x32xf32> -> vector<8x32xf32>
    %c0_10 = arith.constant 0 : index
    %c0_11 = arith.constant 0 : index
    %21 = vector.load %arg5[%c0_10, %c0_11] : memref<1x32xf32, #tpu.memory_space<vmem>>, vector<1x32xf32>
    %22 = vector.broadcast %21 : vector<1x32xf32> to vector<8x32xf32>
    %23 = arith.addf %20, %22 : vector<8x32xf32>
    %cst_12 = arith.constant 0.000000e+00 : f32
    %24 = vector.broadcast %cst_12 : f32 to vector<8x32xf32>
    %25 = arith.maximumf %23, %24 : vector<8x32xf32>
    %c0_13 = arith.constant 0 : index
    %c0_14 = arith.constant 0 : index
    %26 = vector.load %arg6[%c0_13, %c0_14] : memref<32x32xf32, #tpu.memory_space<vmem>>, vector<32x32xf32>
    %cst_15 = arith.constant dense<0.000000e+00> : vector<8x32xf32>
    %27 = tpu.matmul %25, %26, %cst_15 {dimension_numbers = #tpu.dot_dimension_numbers<[1], [0], [0], [1], [0, 0, 1, 1], [], []>} : vector<8x32xf32>, vector<32x32xf32>, vector<8x32xf32> -> vector<8x32xf32>
    %c0_16 = arith.constant 0 : index
    %c0_17 = arith.constant 0 : index
    %28 = vector.load %arg7[%c0_16, %c0_17] : memref<1x32xf32, #tpu.memory_space<vmem>>, vector<1x32xf32>
    %29 = vector.broadcast %28 : vector<1x32xf32> to vector<8x32xf32>
    %30 = arith.addf %27, %29 : vector<8x32xf32>
    %cst_18 = arith.constant 0.000000e+00 : f32
    %31 = vector.broadcast %cst_18 : f32 to vector<8x32xf32>
    %32 = arith.maximumf %30, %31 : vector<8x32xf32>
    %c0_19 = arith.constant 0 : index
    %c0_20 = arith.constant 0 : index
    %33 = vector.load %arg8[%c0_19, %c0_20] : memref<32x32xf32, #tpu.memory_space<vmem>>, vector<32x32xf32>
    %cst_21 = arith.constant dense<0.000000e+00> : vector<8x32xf32>
    %34 = tpu.matmul %32, %33, %cst_21 {dimension_numbers = #tpu.dot_dimension_numbers<[1], [0], [0], [1], [0, 0, 1, 1], [], []>} : vector<8x32xf32>, vector<32x32xf32>, vector<8x32xf32> -> vector<8x32xf32>
    %c0_22 = arith.constant 0 : index
    %c0_23 = arith.constant 0 : index
    %35 = vector.load %arg9[%c0_22, %c0_23] : memref<1x32xf32, #tpu.memory_space<vmem>>, vector<1x32xf32>
    %36 = vector.broadcast %35 : vector<1x32xf32> to vector<8x32xf32>
    %37 = arith.addf %34, %36 : vector<8x32xf32>
    %cst_24 = arith.constant 0.000000e+00 : f32
    %38 = vector.broadcast %cst_24 : f32 to vector<8x32xf32>
    %39 = arith.maximumf %37, %38 : vector<8x32xf32>
    %c0_25 = arith.constant 0 : index
    %c0_26 = arith.constant 0 : index
    %40 = vector.load %arg10[%c0_25, %c0_26] : memref<32x64xf32, #tpu.memory_space<vmem>>, vector<32x64xf32>
    %cst_27 = arith.constant dense<0.000000e+00> : vector<8x64xf32>
    %41 = tpu.matmul %39, %40, %cst_27 {dimension_numbers = #tpu.dot_dimension_numbers<[1], [0], [0], [1], [0, 0, 1, 1], [], []>} : vector<8x32xf32>, vector<32x64xf32>, vector<8x64xf32> -> vector<8x64xf32>
    %c0_28 = arith.constant 0 : index
    %c0_29 = arith.constant 0 : index
    %42 = vector.load %arg11[%c0_28, %c0_29] : memref<32x64xf32, #tpu.memory_space<vmem>>, vector<32x64xf32>
    %cst_30 = arith.constant dense<0.000000e+00> : vector<32x64xf32>
    %43 = tpu.matmul %9, %42, %cst_30 {dimension_numbers = #tpu.dot_dimension_numbers<[1], [0], [0], [1], [0, 0, 1, 1], [], []>} : vector<32x32xf32>, vector<32x64xf32>, vector<32x64xf32> -> vector<32x64xf32>
    %44 = tpu.concatenate %41, %41, %41, %41 in 0 : vector<8x64xf32>, vector<8x64xf32>, vector<8x64xf32>, vector<8x64xf32> -> vector<32x64xf32>
    %45 = arith.addf %44, %43 : vector<32x64xf32>
    %c0_31 = arith.constant 0 : index
    %c0_32 = arith.constant 0 : index
    %46 = vector.load %arg12[%c0_31, %c0_32] : memref<1x64xf32, #tpu.memory_space<vmem>>, vector<1x64xf32>
    %47 = vector.broadcast %46 : vector<1x64xf32> to vector<32x64xf32>
    %48 = arith.addf %45, %47 : vector<32x64xf32>
    %cst_33 = arith.constant 0.000000e+00 : f32
    %49 = vector.broadcast %cst_33 : f32 to vector<32x64xf32>
    %50 = arith.maximumf %48, %49 : vector<32x64xf32>
    %c0_34 = arith.constant 0 : index
    %c0_35 = arith.constant 0 : index
    %51 = vector.load %arg13[%c0_34, %c0_35] : memref<64x64xf32, #tpu.memory_space<vmem>>, vector<64x64xf32>
    %cst_36 = arith.constant dense<0.000000e+00> : vector<32x64xf32>
    %52 = tpu.matmul %50, %51, %cst_36 {dimension_numbers = #tpu.dot_dimension_numbers<[1], [0], [0], [1], [0, 0, 1, 1], [], []>} : vector<32x64xf32>, vector<64x64xf32>, vector<32x64xf32> -> vector<32x64xf32>
    %c0_37 = arith.constant 0 : index
    %c0_38 = arith.constant 0 : index
    %53 = vector.load %arg14[%c0_37, %c0_38] : memref<1x64xf32, #tpu.memory_space<vmem>>, vector<1x64xf32>
    %54 = vector.broadcast %53 : vector<1x64xf32> to vector<32x64xf32>
    %55 = arith.addf %52, %54 : vector<32x64xf32>
    %cst_39 = arith.constant 0.000000e+00 : f32
    %56 = vector.broadcast %cst_39 : f32 to vector<32x64xf32>
    %57 = arith.maximumf %55, %56 : vector<32x64xf32>
    %c0_40 = arith.constant 0 : index
    %c0_41 = arith.constant 0 : index
    %58 = vector.load %arg15[%c0_40, %c0_41] : memref<64x8xf32, #tpu.memory_space<vmem>>, vector<64x8xf32>
    %cst_42 = arith.constant dense<0.000000e+00> : vector<32x8xf32>
    %59 = tpu.matmul %57, %58, %cst_42 {dimension_numbers = #tpu.dot_dimension_numbers<[1], [0], [0], [1], [0, 0, 1, 1], [], []>} : vector<32x64xf32>, vector<64x8xf32>, vector<32x8xf32> -> vector<32x8xf32>
    %c0_43 = arith.constant 0 : index
    %c0_44 = arith.constant 0 : index
    %60 = vector.load %arg16[%c0_43, %c0_44] : memref<1x8xf32, #tpu.memory_space<vmem>>, vector<1x8xf32>
    %61 = vector.broadcast %60 : vector<1x8xf32> to vector<32x8xf32>
    %62 = arith.addf %59, %61 : vector<32x8xf32>
    %c0_45 = arith.constant 0 : index
    %c0_46 = arith.constant 0 : index
    %63 = vector.load %arg17[%c0_45, %c0_46] : memref<32x8xf32, #tpu.memory_space<vmem>>, vector<32x8xf32>
    tpu.vector_store %arg17[%c0_45, %c0_46], %62 {strides = array<i32>} : memref<32x8xf32, #tpu.memory_space<vmem>>, vector<32x8xf32>,
    return
  }
  func.func @transform_0(%arg0: i32) -> (i32, i32) {
    %c0_i32 = arith.constant 0 : i32
    %c0_i32_0 = arith.constant 0 : i32
    return %arg0, %c0_i32 : i32, i32
  }
  func.func @transform_1(%arg0: i32) -> (i32, i32) {
    %c0_i32 = arith.constant 0 : i32
    %c0_i32_0 = arith.constant 0 : i32
    %c0_i32_1 = arith.constant 0 : i32
    return %c0_i32, %c0_i32_0 : i32, i32
  }
  func.func @transform_2(%arg0: i32) -> (i32, i32) {
    %c0_i32 = arith.constant 0 : i32
    %c0_i32_0 = arith.constant 0 : i32
    %c0_i32_1 = arith.constant 0 : i32
    return %c0_i32, %c0_i32_0 : i32, i32
  }
  func.func @transform_3(%arg0: i32) -> (i32, i32) {
    %c0_i32 = arith.constant 0 : i32
    %c0_i32_0 = arith.constant 0 : i32
    %c0_i32_1 = arith.constant 0 : i32
    return %c0_i32, %c0_i32_0 : i32, i32
  }
  func.func @transform_4(%arg0: i32) -> (i32, i32) {
    %c0_i32 = arith.constant 0 : i32
    %c0_i32_0 = arith.constant 0 : i32
    %c0_i32_1 = arith.constant 0 : i32
    return %c0_i32, %c0_i32_0 : i32, i32
  }
  func.func @transform_5(%arg0: i32) -> (i32, i32) {
    %c0_i32 = arith.constant 0 : i32
    %c0_i32_0 = arith.constant 0 : i32
    %c0_i32_1 = arith.constant 0 : i32
    return %c0_i32, %c0_i32_0 : i32, i32
  }
  func.func @transform_6(%arg0: i32) -> (i32, i32) {
    %c0_i32 = arith.constant 0 : i32
    %c0_i32_0 = arith.constant 0 : i32
    %c0_i32_1 = arith.constant 0 : i32
    return %c0_i32, %c0_i32_0 : i32, i32
  }
  func.func @transform_7(%arg0: i32) -> (i32, i32) {
    %c0_i32 = arith.constant 0 : i32
    %c0_i32_0 = arith.constant 0 : i32
    %c0_i32_1 = arith.constant 0 : i32
    return %c0_i32, %c0_i32_0 : i32, i32
  }
  func.func @transform_8(%arg0: i32) -> (i32, i32) {
    %c0_i32 = arith.constant 0 : i32
    %c0_i32_0 = arith.constant 0 : i32
    %c0_i32_1 = arith.constant 0 : i32
    return %c0_i32, %c0_i32_0 : i32, i32
  }
  func.func @transform_9(%arg0: i32) -> (i32, i32) {
    %c0_i32 = arith.constant 0 : i32
    %c0_i32_0 = arith.constant 0 : i32
    %c0_i32_1 = arith.constant 0 : i32
    return %c0_i32, %c0_i32_0 : i32, i32
  }
  func.func @transform_10(%arg0: i32) -> (i32, i32) {
    %c0_i32 = arith.constant 0 : i32
    %c0_i32_0 = arith.constant 0 : i32
    %c0_i32_1 = arith.constant 0 : i32
    return %c0_i32, %c0_i32_0 : i32, i32
  }
  func.func @transform_11(%arg0: i32) -> (i32, i32) {
    %c0_i32 = arith.constant 0 : i32
    %c0_i32_0 = arith.constant 0 : i32
    %c0_i32_1 = arith.constant 0 : i32
    return %c0_i32, %c0_i32_0 : i32, i32
  }
  func.func @transform_12(%arg0: i32) -> (i32, i32) {
    %c0_i32 = arith.constant 0 : i32
    %c0_i32_0 = arith.constant 0 : i32
    %c0_i32_1 = arith.constant 0 : i32
    return %c0_i32, %c0_i32_0 : i32, i32
  }
  func.func @transform_13(%arg0: i32) -> (i32, i32) {
    %c0_i32 = arith.constant 0 : i32
    %c0_i32_0 = arith.constant 0 : i32
    %c0_i32_1 = arith.constant 0 : i32
    return %c0_i32, %c0_i32_0 : i32, i32
  }
  func.func @transform_14(%arg0: i32) -> (i32, i32) {
    %c0_i32 = arith.constant 0 : i32
    %c0_i32_0 = arith.constant 0 : i32
    %c0_i32_1 = arith.constant 0 : i32
    return %c0_i32, %c0_i32_0 : i32, i32
  }
  func.func @transform_15(%arg0: i32) -> (i32, i32) {
    %c0_i32 = arith.constant 0 : i32
    %c0_i32_0 = arith.constant 0 : i32
    %c0_i32_1 = arith.constant 0 : i32
    return %c0_i32, %c0_i32_0 : i32, i32
  }
  func.func @transform_16(%arg0: i32) -> (i32, i32) {
    %c0_i32 = arith.constant 0 : i32
    %c0_i32_0 = arith.constant 0 : i32
    return %arg0, %c0_i32 : i32, i32
  }
}

module attributes {stable_mosaic.version = 11 : i64} {
  func.func @kernel(%arg0: i32, %arg1: memref<32x32xf32, #tpu.memory_space<vmem>>, %arg2: memref<32x64xf32, #tpu.memory_space<vmem>>, %arg3: memref<1x64xf32, #tpu.memory_space<vmem>>, %arg4: memref<32x32xf32, #tpu.memory_space<vmem>>, %arg5: memref<1x32xf32, #tpu.memory_space<vmem>>, %arg6: memref<32x32xf32, #tpu.memory_space<vmem>>, %arg7: memref<1x32xf32, #tpu.memory_space<vmem>>, %arg8: memref<32x32xf32, #tpu.memory_space<vmem>>, %arg9: memref<1x32xf32, #tpu.memory_space<vmem>>, %arg10: memref<32x64xf32, #tpu.memory_space<vmem>>, %arg11: memref<32x64xf32, #tpu.memory_space<vmem>>, %arg12: memref<1x64xf32, #tpu.memory_space<vmem>>, %arg13: memref<64x64xf32, #tpu.memory_space<vmem>>, %arg14: memref<1x64xf32, #tpu.memory_space<vmem>>, %arg15: memref<64x8xf32, #tpu.memory_space<vmem>>, %arg16: memref<1x8xf32, #tpu.memory_space<vmem>>, %arg17: memref<32x8xf32, #tpu.memory_space<vmem>>) attributes {dimension_semantics = [#tpu.dimension_semantics<parallel>], iteration_bounds = array<i64: 1>, scalar_prefetch = 0 : i64, scratch_operands = 0 : i64, tpu.core_type = #tpu.core_type<tc>, window_params = [{transform_indices = @transform_0, window_bounds = array<i64: 32, 32>}, {pipeline_mode = #tpu.pipeline_mode<synchronous>, transform_indices = @transform_1, window_bounds = array<i64: 32, 64>}, {pipeline_mode = #tpu.pipeline_mode<synchronous>, transform_indices = @transform_2, window_bounds = array<i64: 1, 64>}, {pipeline_mode = #tpu.pipeline_mode<synchronous>, transform_indices = @transform_3, window_bounds = array<i64: 32, 32>}, {pipeline_mode = #tpu.pipeline_mode<synchronous>, transform_indices = @transform_4, window_bounds = array<i64: 1, 32>}, {pipeline_mode = #tpu.pipeline_mode<synchronous>, transform_indices = @transform_5, window_bounds = array<i64: 32, 32>}, {pipeline_mode = #tpu.pipeline_mode<synchronous>, transform_indices = @transform_6, window_bounds = array<i64: 1, 32>}, {pipeline_mode = #tpu.pipeline_mode<synchronous>, transform_indices = @transform_7, window_bounds = array<i64: 32, 32>}, {pipeline_mode = #tpu.pipeline_mode<synchronous>, transform_indices = @transform_8, window_bounds = array<i64: 1, 32>}, {pipeline_mode = #tpu.pipeline_mode<synchronous>, transform_indices = @transform_9, window_bounds = array<i64: 32, 64>}, {pipeline_mode = #tpu.pipeline_mode<synchronous>, transform_indices = @transform_10, window_bounds = array<i64: 32, 64>}, {pipeline_mode = #tpu.pipeline_mode<synchronous>, transform_indices = @transform_11, window_bounds = array<i64: 1, 64>}, {pipeline_mode = #tpu.pipeline_mode<synchronous>, transform_indices = @transform_12, window_bounds = array<i64: 64, 64>}, {pipeline_mode = #tpu.pipeline_mode<synchronous>, transform_indices = @transform_13, window_bounds = array<i64: 1, 64>}, {pipeline_mode = #tpu.pipeline_mode<synchronous>, transform_indices = @transform_14, window_bounds = array<i64: 64, 8>}, {pipeline_mode = #tpu.pipeline_mode<synchronous>, transform_indices = @transform_15, window_bounds = array<i64: 1, 8>}, {transform_indices = @transform_16, window_bounds = array<i64: 32, 8>}]} {
    %c0 = arith.constant 0 : index
    %c0_0 = arith.constant 0 : index
    %0 = vector.load %arg1[%c0, %c0_0] : memref<32x32xf32, #tpu.memory_space<vmem>>, vector<32x32xf32>
    %c0_1 = arith.constant 0 : index
    %c0_2 = arith.constant 0 : index
    %1 = vector.load %arg2[%c0_1, %c0_2] : memref<32x64xf32, #tpu.memory_space<vmem>>, vector<32x64xf32>
    %cst = arith.constant dense<0.000000e+00> : vector<32x64xf32>
    %2 = tpu.matmul %0, %1, %cst {dimension_numbers = #tpu.dot_dimension_numbers<[1], [0], [0], [1], [0, 0, 1, 1], [], []>} : vector<32x32xf32>, vector<32x64xf32>, vector<32x64xf32> -> vector<32x64xf32>
    %c0_3 = arith.constant 0 : index
    %c0_4 = arith.constant 0 : index
    %3 = vector.load %arg3[%c0_3, %c0_4] : memref<1x64xf32, #tpu.memory_space<vmem>>, vector<1x64xf32>
    %4 = vector.broadcast %3 : vector<1x64xf32> to vector<32x64xf32>
    %5 = arith.addf %2, %4 : vector<32x64xf32>
    %cst_5 = arith.constant 0.000000e+00 : f32
    %6 = vector.broadcast %cst_5 : f32 to vector<32x64xf32>
    %7 = arith.maximumf %5, %6 : vector<32x64xf32>
    %8 = vector.extract_strided_slice %7 {offsets = [0, 0], sizes = [32, 32], strides = [1, 1]} : vector<32x64xf32> to vector<32x32xf32>
    %9 = vector.extract_strided_slice %7 {offsets = [0, 32], sizes = [32, 32], strides = [1, 1]} : vector<32x64xf32> to vector<32x32xf32>
    %10 = vector.extract_strided_slice %8 {offsets = [0, 0], sizes = [8, 32], strides = [1, 1]} : vector<32x32xf32> to vector<8x32xf32>
    %11 = vector.extract_strided_slice %8 {offsets = [8, 0], sizes = [8, 32], strides = [1, 1]} : vector<32x32xf32> to vector<8x32xf32>
    %12 = arith.addf %10, %11 : vector<8x32xf32>
    %13 = vector.extract_strided_slice %8 {offsets = [16, 0], sizes = [8, 32], strides = [1, 1]} : vector<32x32xf32> to vector<8x32xf32>
    %14 = arith.addf %12, %13 : vector<8x32xf32>
    %15 = vector.extract_strided_slice %8 {offsets = [24, 0], sizes = [8, 32], strides = [1, 1]} : vector<32x32xf32> to vector<8x32xf32>
    %16 = arith.addf %14, %15 : vector<8x32xf32>
    %cst_6 = arith.constant 2.500000e-01 : f32
    %17 = vector.broadcast %cst_6 : f32 to vector<8x32xf32>
    %18 = arith.mulf %16, %17 : vector<8x32xf32>
    %c0_7 = arith.constant 0 : index
    %c0_8 = arith.constant 0 : index
    %19 = vector.load %arg4[%c0_7, %c0_8] : memref<32x32xf32, #tpu.memory_space<vmem>>, vector<32x32xf32>
    %cst_9 = arith.constant dense<0.000000e+00> : vector<8x32xf32>
    %20 = tpu.matmul %18, %19, %cst_9 {dimension_numbers = #tpu.dot_dimension_numbers<[1], [0], [0], [1], [0, 0, 1, 1], [], []>} : vector<8x32xf32>, vector<32x32xf32>, vector<8x32xf32> -> vector<8x32xf32>
    %c0_10 = arith.constant 0 : index
    %c0_11 = arith.constant 0 : index
    %21 = vector.load %arg5[%c0_10, %c0_11] : memref<1x32xf32, #tpu.memory_space<vmem>>, vector<1x32xf32>
    %22 = vector.broadcast %21 : vector<1x32xf32> to vector<8x32xf32>
    %23 = arith.addf %20, %22 : vector<8x32xf32>
    %cst_12 = arith.constant 0.000000e+00 : f32
    %24 = vector.broadcast %cst_12 : f32 to vector<8x32xf32>
    %25 = arith.maximumf %23, %24 : vector<8x32xf32>
    %c0_13 = arith.constant 0 : index
    %c0_14 = arith.constant 0 : index
    %26 = vector.load %arg6[%c0_13, %c0_14] : memref<32x32xf32, #tpu.memory_space<vmem>>, vector<32x32xf32>
    %cst_15 = arith.constant dense<0.000000e+00> : vector<8x32xf32>
    %27 = tpu.matmul %25, %26, %cst_15 {dimension_numbers = #tpu.dot_dimension_numbers<[1], [0], [0], [1], [0, 0, 1, 1], [], []>} : vector<8x32xf32>, vector<32x32xf32>, vector<8x32xf32> -> vector<8x32xf32>
    %c0_16 = arith.constant 0 : index
    %c0_17 = arith.constant 0 : index
    %28 = vector.load %arg7[%c0_16, %c0_17] : memref<1x32xf32, #tpu.memory_space<vmem>>, vector<1x32xf32>
    %29 = vector.broadcast %28 : vector<1x32xf32> to vector<8x32xf32>
    %30 = arith.addf %27, %29 : vector<8x32xf32>
    %cst_18 = arith.constant 0.000000e+00 : f32
    %31 = vector.broadcast %cst_18 : f32 to vector<8x32xf32>
    %32 = arith.maximumf %30, %31 : vector<8x32xf32>
    %c0_19 = arith.constant 0 : index
    %c0_20 = arith.constant 0 : index
    %33 = vector.load %arg8[%c0_19, %c0_20] : memref<32x32xf32, #tpu.memory_space<vmem>>, vector<32x32xf32>
    %cst_21 = arith.constant dense<0.000000e+00> : vector<8x32xf32>
    %34 = tpu.matmul %32, %33, %cst_21 {dimension_numbers = #tpu.dot_dimension_numbers<[1], [0], [0], [1], [0, 0, 1, 1], [], []>} : vector<8x32xf32>, vector<32x32xf32>, vector<8x32xf32> -> vector<8x32xf32>
    %c0_22 = arith.constant 0 : index
    %c0_23 = arith.constant 0 : index
    %35 = vector.load %arg9[%c0_22, %c0_23] : memref<1x32xf32, #tpu.memory_space<vmem>>, vector<1x32xf32>
    %36 = vector.broadcast %35 : vector<1x32xf32> to vector<8x32xf32>
    %37 = arith.addf %34, %36 : vector<8x32xf32>
    %cst_24 = arith.constant 0.000000e+00 : f32
    %38 = vector.broadcast %cst_24 : f32 to vector<8x32xf32>
    %39 = arith.maximumf %37, %38 : vector<8x32xf32>
    %c0_25 = arith.constant 0 : index
    %c0_26 = arith.constant 0 : index
    %40 = vector.load %arg10[%c0_25, %c0_26] : memref<32x64xf32, #tpu.memory_space<vmem>>, vector<32x64xf32>
    %cst_27 = arith.constant dense<0.000000e+00> : vector<8x64xf32>
    %41 = tpu.matmul %39, %40, %cst_27 {dimension_numbers = #tpu.dot_dimension_numbers<[1], [0], [0], [1], [0, 0, 1, 1], [], []>} : vector<8x32xf32>, vector<32x64xf32>, vector<8x64xf32> -> vector<8x64xf32>
    %c0_28 = arith.constant 0 : index
    %c0_29 = arith.constant 0 : index
    %42 = vector.load %arg11[%c0_28, %c0_29] : memref<32x64xf32, #tpu.memory_space<vmem>>, vector<32x64xf32>
    %cst_30 = arith.constant dense<0.000000e+00> : vector<32x64xf32>
    %43 = tpu.matmul %9, %42, %cst_30 {dimension_numbers = #tpu.dot_dimension_numbers<[1], [0], [0], [1], [0, 0, 1, 1], [], []>} : vector<32x32xf32>, vector<32x64xf32>, vector<32x64xf32> -> vector<32x64xf32>
    %44 = tpu.concatenate %41, %41, %41, %41 in 0 : vector<8x64xf32>, vector<8x64xf32>, vector<8x64xf32>, vector<8x64xf32> -> vector<32x64xf32>
    %45 = arith.addf %44, %43 : vector<32x64xf32>
    %c0_31 = arith.constant 0 : index
    %c0_32 = arith.constant 0 : index
    %46 = vector.load %arg12[%c0_31, %c0_32] : memref<1x64xf32, #tpu.memory_space<vmem>>, vector<1x64xf32>
    %47 = vector.broadcast %46 : vector<1x64xf32> to vector<32x64xf32>
    %48 = arith.addf %45, %47 : vector<32x64xf32>
    %cst_33 = arith.constant 0.000000e+00 : f32
    %49 = vector.broadcast %cst_33 : f32 to vector<32x64xf32>
    %50 = arith.maximumf %48, %49 : vector<32x64xf32>
    %c0_34 = arith.constant 0 : index
    %c0_35 = arith.constant 0 : index
    %51 = vector.load %arg13[%c0_34, %c0_35] : memref<64x64xf32, #tpu.memory_space<vmem>>, vector<64x64xf32>
    %cst_36 = arith.constant dense<0.000000e+00> : vector<32x64xf32>
    %52 = tpu.matmul %50, %51, %cst_36 {dimension_numbers = #tpu.dot_dimension_numbers<[1], [0], [0], [1], [0, 0, 1, 1], [], []>} : vector<32x64xf32>, vector<64x64xf32>, vector<32x64xf32> -> vector<32x64xf32>
    %c0_37 = arith.constant 0 : index
    %c0_38 = arith.constant 0 : index
    %53 = vector.load %arg14[%c0_37, %c0_38] : memref<1x64xf32, #tpu.memory_space<vmem>>, vector<1x64xf32>
    %54 = vector.broadcast %53 : vector<1x64xf32> to vector<32x64xf32>
    %55 = arith.addf %52, %54 : vector<32x64xf32>
    %cst_39 = arith.constant 0.000000e+00 : f32
    %56 = vector.broadcast %cst_39 : f32 to vector<32x64xf32>
    %57 = arith.maximumf %55, %56 : vector<32x64xf32>
    %c0_40 = arith.constant 0 : index
    %c0_41 = arith.constant 0 : index
    %58 = vector.load %arg15[%c0_40, %c0_41] : memref<64x8xf32, #tpu.memory_space<vmem>>, vector<64x8xf32>
    %cst_42 = arith.constant dense<0.000000e+00> : vector<32x8xf32>
    %59 = tpu.matmul %57, %58, %cst_42 {dimension_numbers = #tpu.dot_dimension_numbers<[1], [0], [0], [1], [0, 0, 1, 1], [], []>} : vector<32x64xf32>, vector<64x8xf32>, vector<32x8xf32> -> vector<32x8xf32>
    %c0_43 = arith.constant 0 : index
    %c0_44 = arith.constant 0 : index
    %60 = vector.load %arg16[%c0_43, %c0_44] : memref<1x8xf32, #tpu.memory_space<vmem>>, vector<1x8xf32>
    %61 = vector.broadcast %60 : vector<1x8xf32> to vector<32x8xf32>
    %62 = arith.addf %59, %61 : vector<32x8xf32>
    %c0_45 = arith.constant 0 : index
    %c0_46 = arith.constant 0 : index
    %63 = vector.load %arg17[%c0_45, %c0_46] : memref<32x8xf32, #tpu.memory_space<vmem>>, vector<32x8xf32>
    tpu.vector_store %arg17[%c0_45, %c0_46], %62 {strides = array<i32>} : memref<32x8xf32, #tpu.memory_space<vmem>>, vector<32x8xf32>,
    return
  }
  func.func @transform_0(%arg0: i32) -> (i32, i32) {
    %c0_i32 = arith.constant 0 : i32
    %c0_i32_0 = arith.constant 0 : i32
    return %arg0, %c0_i32 : i32, i32
  }
  func.func @transform_1(%arg0: i32) -> (i32, i32) {
    %c0_i32 = arith.constant 0 : i32
    %c0_i32_0 = arith.constant 0 : i32
    %c0_i32_1 = arith.constant 0 : i32
    return %c0_i32, %c0_i32_0 : i32, i32
  }
  func.func @transform_2(%arg0: i32) -> (i32, i32) {
    %c0_i32 = arith.constant 0 : i32
    %c0_i32_0 = arith.constant 0 : i32
    %c0_i32_1 = arith.constant 0 : i32
    return %c0_i32, %c0_i32_0 : i32, i32
  }
  func.func @transform_3(%arg0: i32) -> (i32, i32) {
    %c0_i32 = arith.constant 0 : i32
    %c0_i32_0 = arith.constant 0 : i32
    %c0_i32_1 = arith.constant 0 : i32
    return %c0_i32, %c0_i32_0 : i32, i32
  }
  func.func @transform_4(%arg0: i32) -> (i32, i32) {
    %c0_i32 = arith.constant 0 : i32
    %c0_i32_0 = arith.constant 0 : i32
    %c0_i32_1 = arith.constant 0 : i32
    return %c0_i32, %c0_i32_0 : i32, i32
  }
  func.func @transform_5(%arg0: i32) -> (i32, i32) {
    %c0_i32 = arith.constant 0 : i32
    %c0_i32_0 = arith.constant 0 : i32
    %c0_i32_1 = arith.constant 0 : i32
    return %c0_i32, %c0_i32_0 : i32, i32
  }
  func.func @transform_6(%arg0: i32) -> (i32, i32) {
    %c0_i32 = arith.constant 0 : i32
    %c0_i32_0 = arith.constant 0 : i32
    %c0_i32_1 = arith.constant 0 : i32
    return %c0_i32, %c0_i32_0 : i32, i32
  }
  func.func @transform_7(%arg0: i32) -> (i32, i32) {
    %c0_i32 = arith.constant 0 : i32
    %c0_i32_0 = arith.constant 0 : i32
    %c0_i32_1 = arith.constant 0 : i32
    return %c0_i32, %c0_i32_0 : i32, i32
  }
  func.func @transform_8(%arg0: i32) -> (i32, i32) {
    %c0_i32 = arith.constant 0 : i32
    %c0_i32_0 = arith.constant 0 : i32
    %c0_i32_1 = arith.constant 0 : i32
    return %c0_i32, %c0_i32_0 : i32, i32
  }
  func.func @transform_9(%arg0: i32) -> (i32, i32) {
    %c0_i32 = arith.constant 0 : i32
    %c0_i32_0 = arith.constant 0 : i32
    %c0_i32_1 = arith.constant 0 : i32
    return %c0_i32, %c0_i32_0 : i32, i32
  }
  func.func @transform_10(%arg0: i32) -> (i32, i32) {
    %c0_i32 = arith.constant 0 : i32
    %c0_i32_0 = arith.constant 0 : i32
    %c0_i32_1 = arith.constant 0 : i32
    return %c0_i32, %c0_i32_0 : i32, i32
  }
  func.func @transform_11(%arg0: i32) -> (i32, i32) {
    %c0_i32 = arith.constant 0 : i32
    %c0_i32_0 = arith.constant 0 : i32
    %c0_i32_1 = arith.constant 0 : i32
    return %c0_i32, %c0_i32_0 : i32, i32
  }
  func.func @transform_12(%arg0: i32) -> (i32, i32) {
    %c0_i32 = arith.constant 0 : i32
    %c0_i32_0 = arith.constant 0 : i32
    %c0_i32_1 = arith.constant 0 : i32
    return %c0_i32, %c0_i32_0 : i32, i32
  }
  func.func @transform_13(%arg0: i32) -> (i32, i32) {
    %c0_i32 = arith.constant 0 : i32
    %c0_i32_0 = arith.constant 0 : i32
    %c0_i32_1 = arith.constant 0 : i32
    return %c0_i32, %c0_i32_0 : i32, i32
  }
  func.func @transform_14(%arg0: i32) -> (i32, i32) {
    %c0_i32 = arith.constant 0 : i32
    %c0_i32_0 = arith.constant 0 : i32
    %c0_i32_1 = arith.constant 0 : i32
    return %c0_i32, %c0_i32_0 : i32, i32
  }
  func.func @transform_15(%arg0: i32) -> (i32, i32) {
    %c0_i32 = arith.constant 0 : i32
    %c0_i32_0 = arith.constant 0 : i32
    %c0_i32_1 = arith.constant 0 : i32
    return %c0_i32, %c0_i32_0 : i32, i32
  }
  func.func @transform_16(%arg0: i32) -> (i32, i32) {
    %c0_i32 = arith.constant 0 : i32
    %c0_i32_0 = arith.constant 0 : i32
    return %arg0, %c0_i32 : i32, i32
  }
}

</mosaic_0001>

<bundles_post_ra>
// kernel: tpu_custom_call.1
= control target key start
LH: loop header
LB: loop body
LE: loop exit
PB: predicated region body
PF: predicated region fallthrough
CT: control target
= control target key end

     0   :  { %s1718_s0 = inlined_call_operand.vmem [shape: f32[32,32], index: 0, kind: input, shape index: {}]   ;;  %s1719_s1 = inlined_call_operand.hbm [shape: f32[32,64], index: 1, kind: input, shape index: {}]   ;;  %s1720_s2 = inlined_call_operand.vmem [shape: f32[1,64], index: 2, kind: input, shape index: {}]   ;;  %s1721_s3 = inlined_call_operand.hbm [shape: f32[32,32], index: 3, kind: input, shape index: {}]   ;;  %s1722_s4 = inlined_call_operand.vmem [shape: f32[1,32], index: 4, kind: input, shape index: {}]   ;;  %s1723_s5 = inlined_call_operand.hbm [shape: f32[32,32], index: 5, kind: input, shape index: {}]   ;;  %s1724_s6 = inlined_call_operand.vmem [shape: f32[1,32], index: 6, kind: input, shape index: {}]   ;;  %s1725_s7 = inlined_call_operand.hbm [shape: f32[32,32], index: 7, kind: input, shape index: {}]   ;;  %s1726_s8 = inlined_call_operand.vmem [shape: f32[1,32], index: 8, kind: input, shape index: {}]   ;;  %s1727_s9 = inlined_call_operand.hbm [shape: f32[32,64], index: 9, kind: input, shape index: {}]   ;;  %s1728_s10 = inlined_call_operand.hbm [shape: f32[32,64], index: 10, kind: input, shape index: {}]   ;;  %s1729_s11 = inlined_call_operand.vmem [shape: f32[1,64], index: 11, kind: input, shape index: {}]   ;;  %s1730_s12 = inlined_call_operand.vmem [shape: f32[64,64], index: 12, kind: input, shape index: {}]   ;;  %s1731_s13 = inlined_call_operand.vmem [shape: f32[1,64], index: 13, kind: input, shape index: {}]   ;;  %s1732_s14 = inlined_call_operand.vmem [shape: f32[64,8], index: 14, kind: input, shape index: {}]   ;;  %s1733_s15 = inlined_call_operand.vmem [shape: f32[1,8], index: 15, kind: input, shape index: {}]   ;;  %s1734_s16 = inlined_call_operand.vmem [shape: f32[32,8], index: 16, kind: output, shape index: {}]  }
   0x1   :  { %1736 = sst [smem:[#allocation16_spill]] %s1718_s0 }
   0x2   :  { %21 = vsyncpa [#allocation3], 0 }
   0x3   :  { %22 = vsyncpa [#allocation5], 0 }
   0x4   :  { %23 = vsyncpa [#allocation8], 0 }
   0x5   :  { %24 = vsyncpa [#allocation11], 0  ;;  %s1385_s21 = smov [#allocation4]   ;;  %s1386_s23 = smov [#allocation7]  }
   0x6   :  { %s46_s22 = sshll.u32 %s1385_s21, 4  ;;  %s74_s24 = sshll.u32 %s1386_s23, 4  ;;  %s47_s22 = int_to_ptr.vmem [resolvable:$true] %s46_s22  ;;  %s1482_s24 = int_to_ptr.vmem [resolvable:$true] %s74_s24 }
   0x7   :  { %s1245_s27 = scalar_lea.hbm %s1721_s3, 512 }
   0x8   :  { %p1246_p0 = scmp.ne.s32.totalorder %s1721_s3, %s1245_s27  ;;  %p1249_p1 = scmp.lt.u32.totalorder %s1245_s27, %s1721_s3 }
   0xa   :  { %p1251_p2 = pnand %p1249_p1, %p1246_p0 }
   0xc   :  { %1254 = shalt.err (!%p1251_p2)
}
   0xd   :  { %s1255_s17 = scalar_lea.vmem %s47_s22, 512  ;;  %p1260_p4 = scmp.lt.s32.totalorder %s47_s22, %s47_s22 }
   0xe   :  { %p1256_p3 = scmp.ne.s32.totalorder %s47_s22, %s1255_s17  ;;  %p1261_p5 = scmp.lt.s32.totalorder %s1255_s17, %s1255_s17 }
  0x10   :  { %p1262_p6 = por %p1261_p5, %p1260_p4 }
  0x12   :  { %p1263_p7 = pnand %p1262_p6, %p1256_p3 }
  0x14   :  { %1266 = shalt.err (!%p1263_p7)
}
  0x15   :  { %s1387_s18 = smov 128   ;;  %s1388_s19 = smov 8  }
  0x16   :  { %52 = dma.hbm_to_vmem [thread:$0]  %s1721_s3, 512, %s47_s22, [#allocation5], %s1387_s18, %s1387_s18, %s1388_s19  }
  0x17   :  { %s1267_s26 = scalar_lea.hbm %s1725_s7, 512 }
  0x18   :  { %p1268_p8 = scmp.ne.s32.totalorder %s1725_s7, %s1267_s26  ;;  %p1271_p9 = scmp.lt.u32.totalorder %s1267_s26, %s1725_s7 }
  0x1a   :  { %p1273_p10 = pnand %p1271_p9, %p1268_p8 }
  0x1c   :  { %1276 = shalt.err (!%p1273_p10)
}
  0x1d   :  { %s1277_s0 = scalar_lea.vmem %s1482_s24, 512  ;;  %p1282_p12 = scmp.lt.s32.totalorder %s1482_s24, %s1482_s24 }
  0x1e   :  { %p1278_p11 = scmp.ne.s32.totalorder %s1482_s24, %s1277_s0  ;;  %p1283_p13 = scmp.lt.s32.totalorder %s1277_s0, %s1277_s0 }
  0x20   :  { %p1284_p0 = por %p1283_p13, %p1282_p12 }
  0x22   :  { %p1285_p1 = pnand %p1284_p0, %p1278_p11 }
  0x24   :  { %1288 = shalt.err (!%p1285_p1)
}
  0x25   :  { %80 = dma.hbm_to_vmem [thread:$0]  %s1725_s7, 512, %s1482_s24, [#allocation8], %s1387_s18, %s1387_s18, %s1388_s19  }
  0x26   :  { %s1389_s17 = smov [#allocation2]   ;;  %s1390_s21 = smov [#allocation6]  }
  0x27   :  { %s32_s20 = sshll.u32 %s1389_s17, 4  ;;  %s60_s23 = sshll.u32 %s1390_s21, 4  ;;  %s33_s20 = int_to_ptr.vmem [resolvable:$true] %s32_s20  ;;  %s1519_s23 = int_to_ptr.vmem [resolvable:$true] %s60_s23 }
  0x28   :  { %s1289_s27 = scalar_lea.hbm %s1719_s1, 512 }
  0x29   :  { %p1290_p2 = scmp.ne.s32.totalorder %s1719_s1, %s1289_s27  ;;  %p1293_p3 = scmp.lt.u32.totalorder %s1289_s27, %s1719_s1 }
  0x2b   :  { %p1295_p4 = pnand %p1293_p3, %p1290_p2 }
  0x2d   :  { %1298 = shalt.err (!%p1295_p4)
}
  0x2e   :  { %s1299_s7 = scalar_lea.vmem %s33_s20, 512  ;;  %p1304_p6 = scmp.lt.s32.totalorder %s33_s20, %s33_s20 }
  0x2f   :  { %p1300_p5 = scmp.ne.s32.totalorder %s33_s20, %s1299_s7  ;;  %p1305_p7 = scmp.lt.s32.totalorder %s1299_s7, %s1299_s7 }
  0x31   :  { %p1306_p8 = por %p1305_p7, %p1304_p6 }
  0x33   :  { %p1307_p9 = pnand %p1306_p8, %p1300_p5 }
  0x35   :  { %1310 = shalt.err (!%p1307_p9)
}
  0x36   :  { %38 = dma.hbm_to_vmem [thread:$0]  %s1719_s1, 512, %s33_s20, [#allocation3], %s1387_s18, %s1387_s18, %s1388_s19  }
  0x37   :  { %s1311_s21 = scalar_lea.hbm %s1723_s5, 512 }
  0x38   :  { %p1312_p10 = scmp.ne.s32.totalorder %s1723_s5, %s1311_s21  ;;  %p1315_p11 = scmp.lt.u32.totalorder %s1311_s21, %s1723_s5 }
  0x3a   :  { %p1317_p12 = pnand %p1315_p11, %p1312_p10 }
  0x3c   :  { %1320 = shalt.err (!%p1317_p12)
}
  0x3d   :  { %s1321_s29 = scalar_lea.vmem %s1519_s23, 512  ;;  %p1326_p0 = scmp.lt.s32.totalorder %s1519_s23, %s1519_s23 }
  0x3e   :  { %p1322_p13 = scmp.ne.s32.totalorder %s1519_s23, %s1321_s29  ;;  %p1327_p1 = scmp.lt.s32.totalorder %s1321_s29, %s1321_s29 }
  0x40   :  { %p1328_p2 = por %p1327_p1, %p1326_p0 }
  0x42   :  { %p1329_p3 = pnand %p1328_p2, %p1322_p13 }
  0x44   :  { %1332 = shalt.err (!%p1329_p3)
}
  0x45   :  { %66 = dma.hbm_to_vmem [thread:$0]  %s1723_s5, 512, %s1519_s23, [#allocation5], %s1387_s18, %s1387_s18, %s1388_s19  }
  0x46   :  { %s1391_s30 = smov [#allocation9]   ;;  %s1392_s7 = smov [#allocation10]  }
  0x47   :  { %s88_s0 = sshll.u32 %s1391_s30, 4  ;;  %s100_s24 = sshll.u32 %s1392_s7, 4  ;;  %s89_s0 = int_to_ptr.vmem [resolvable:$true] %s88_s0  ;;  %s1556_s24 = int_to_ptr.vmem [resolvable:$true] %s100_s24 }
  0x48   :  { %s1333_s17 = scalar_lea.hbm %s1727_s9, 512 }
  0x49   :  { %p1334_p4 = scmp.ne.s32.totalorder %s1727_s9, %s1333_s17  ;;  %p1337_p5 = scmp.lt.u32.totalorder %s1333_s17, %s1727_s9 }
  0x4b   :  { %p1339_p6 = pnand %p1337_p5, %p1334_p4 }
  0x4d   :  { %1342 = shalt.err (!%p1339_p6)
}
  0x4e   :  { %s1343_s5 = scalar_lea.vmem %s89_s0, 512  ;;  %p1348_p8 = scmp.lt.s32.totalorder %s89_s0, %s89_s0 }
  0x4f   :  { %p1344_p7 = scmp.ne.s32.totalorder %s89_s0, %s1343_s5  ;;  %p1349_p9 = scmp.lt.s32.totalorder %s1343_s5, %s1343_s5 }
  0x51   :  { %p1350_p10 = por %p1349_p9, %p1348_p8 }
  0x53   :  { %p1351_p11 = pnand %p1350_p10, %p1344_p7 }
  0x55   :  { %1354 = shalt.err (!%p1351_p11)
}
  0x56   :  { %94 = dma.hbm_to_vmem [thread:$0]  %s1727_s9, 512, %s89_s0, [#allocation8], %s1387_s18, %s1387_s18, %s1388_s19  }
  0x57   :  { %s1355_s20 = scalar_lea.hbm %s1728_s10, 512 }
  0x58   :  { %p1356_p12 = scmp.ne.s32.totalorder %s1728_s10, %s1355_s20  ;;  %p1359_p13 = scmp.lt.u32.totalorder %s1355_s20, %s1728_s10 }
  0x5a   :  { %p1361_p0 = pnand %p1359_p13, %p1356_p12 }
  0x5c   :  { %1364 = shalt.err (!%p1361_p0)
}
  0x5d   :  { %s1365_s17 = scalar_lea.vmem %s1556_s24, 512  ;;  %p1370_p2 = scmp.lt.s32.totalorder %s1556_s24, %s1556_s24 }
  0x5e   :  { %p1366_p1 = scmp.ne.s32.totalorder %s1556_s24, %s1365_s17  ;;  %p1371_p3 = scmp.lt.s32.totalorder %s1365_s17, %s1365_s17 }
  0x60   :  { %p1372_p4 = por %p1371_p3, %p1370_p2 }
  0x62   :  { %p1373_p5 = pnand %p1372_p4, %p1366_p1 }
  0x64   :  { %1376 = shalt.err (!%p1373_p5)
}
  0x65   :  { %106 = dma.hbm_to_vmem [thread:$0]  %s1728_s10, 512, %s1556_s24, [#allocation11], %s1387_s18, %s1387_s18, %s1388_s19  }
  0x66   :  { %1377 = dma.done.wait [#allocation3], 512  }
  0x67   :  { %1378 = vsyncadd [#allocation3], 4294966784 }
  0x68   :  { %1379 = dma.done.wait [#allocation5], 1024  }
  0x69   :  { %1380 = vsyncadd [#allocation5], 4294966272 }
  0x6a   :  { %1381 = dma.done.wait [#allocation8], 1024  }
  0x6b   :  { %1382 = vsyncadd [#allocation8], 4294966272 }
  0x6c   :  { %1383 = dma.done.wait [#allocation11], 512  }
  0x6d   :  { %1384 = vsyncadd [#allocation11], 4294966784  ;;  %vm150_vm0 = vcmask 261120   ;;  %v139_v0 = vld [vmem:[#allocation2] sm:$0xff]  ;;  %v140_v1 = vld [vmem:[#allocation2 + $0x8] sm:$0xff]  ;;  %s1737_s26 = sld [smem:[#allocation16_spill]] }
  0x6e   :  { %v141_v2 = vld [vmem:[#allocation2 + $0x10] sm:$0xff]  ;;  %v1161_v3 = vpack.c.bf16 %v140_v1, %v139_v0  ;;  %v142_v4 = vld [vmem:[#allocation2 + $0x18] sm:$0xff]  ;;  %v256_v10 = vld [vmem:[#allocation4] sm:$0xff]  ;;  %v1393_v13 = vmov 0.0|0.0   ;;  %vm1394_vm1 = vmmov 0   ;;  %v1395_v17 = vmov 0.0  }
  0x6f   :  { %v1165_v6 = vpack.c.bf16 %v142_v4, %v141_v2  ;;  %v257_v11 = vld [vmem:[#allocation4 + $0x8] sm:$0xff]  ;;  %1169 = vmatprep.subr.bf16.mxu1 %v1393_v13  ;;  %v258_v14 = vld [vmem:[#allocation4 + $0x10] sm:$0xff]  ;;  %v259_v15 = vld [vmem:[#allocation4 + $0x18] sm:$0xff]  ;;  %1067 = vmatprep.mubr.msk.f32.mxu1 %vm1394_vm1, %v1395_v17  ;;  %s1396_s29 = smov 96   ;;  %vm731_vm2 = vcmask 523264   ;;  %vm945_vm3 = vcmask 64512  }
  0x70   :  { %1162 = vmatprep.subr.bf16.mxu0 %v1161_v3  ;;  %v1170_v12 = vpack.c.bf16 %v257_v11, %v256_v10  ;;  %v1173_v16 = vpack.c.bf16 %v259_v15, %v258_v14  ;;  %v958_v18 = vld [vmem:[%s1720_s2] ss:$0 sm:$0xff]  ;;  %v342_v21 = vld [vmem:[#allocation6 + $0x8] sm:$0xff]  ;;  %v343_v38 = vld [vmem:[#allocation6 + $0x10] sm:$0xff] }
  0x71   :  { %1164 = vmatpush3.bf16.msra.mxu0 %v1161_v3  ;;  %v341_v20 = vld [vmem:[#allocation6] sm:$0xff]  ;;  %v344_v39 = vld [vmem:[#allocation6 + $0x18] sm:$0xff]  ;;  %v427_v42 = vld [vmem:[#allocation7 + $0x8] sm:$0xff] }
  0x72   :  { %1166 = vmatprep.subr.bf16.mxu0 %v1165_v6  ;;  %1171 = vmatpush3.bf16.msra.mxu1 %v1170_v12  ;;  %v1176_v24 = vpack.c.bf16 %v342_v21, %v341_v20  ;;  %v1179_v40 = vpack.c.bf16 %v344_v39, %v343_v38  ;;  %v426_v41 = vld [vmem:[#allocation7] sm:$0xff]  ;;  %v428_v49 = vld [vmem:[#allocation7 + $0x10] sm:$0xff]  ;;  %v429_v50 = vld [vmem:[#allocation7 + $0x18] sm:$0xff] }
  0x73   :  { %v135_v5 = vld [vmem:[%s1737_s26] sm:$0xff]  ;;  %v136_v7 = vld [vmem:[%s1737_s26 + $0x8] sm:$0xff]  ;;  %v137_v8 = vld [vmem:[%s1737_s26 + $0x10] sm:$0xff]  ;;  %1172 = vmatprep.subr.bf16.mxu1 %v1393_v13  ;;  %v1182_v43 = vpack.c.bf16 %v427_v42, %v426_v41  ;;  %v1185_v51 = vpack.c.bf16 %v429_v50, %v428_v49 }
  0x74   :  { %1053 = vmatprep.mubr.msk.f32.mxu0 %vm150_vm0, %v135_v5  ;;  %v138_v9 = vld [vmem:[%s1737_s26 + $0x18] sm:$0xff]  ;;  %v963_v44 = vld [vmem:[%s1722_s4] ss:$0 sm:$0xff]  ;;  %v589_v53 = vld [vmem:[#allocation10 + $0x8] sm:$0xff] }
  0x75   :  { %1168 = vmatpush3.bf16.msra.mxu0 %v1165_v6  ;;  %v588_v52 = vld [vmem:[#allocation10] sm:$0xff]  ;;  %v512_v56 = vld [vmem:[#allocation9 + $0x8] sm:$0xff]  ;;  %v590_v60 = vld [vmem:[#allocation10 + $0x10] sm:$0xff] }
  0x76   :  { %1175 = vmatprep.subr.bf16.mxu0 %v1393_v13  ;;  %1174 = vmatpush3.bf16.msra.mxu1 %v1173_v16  ;;  %v1193_v54 = vpack.c.bf16 %v589_v53, %v588_v52  ;;  %v511_v55 = vld [vmem:[#allocation9] sm:$0xff]  ;;  %v591_v61 = vld [vmem:[#allocation10 + $0x18] sm:$0xff]  ;;  %v513_v6 = vld [vmem:[#allocation9 + $0x10] sm:$0xff] }
  0x77   :  { %1181 = vmatprep.subr.bf16.mxu1 %v1393_v13  ;;  %v1188_v57 = vpack.c.bf16 %v512_v56, %v511_v55  ;;  %v965_v58 = vld [vmem:[%s1724_s6] ss:$0 sm:$0xff]  ;;  %v1197_v1 = vpack.c.bf16 %v591_v61, %v590_v60  ;;  %v717_v10 = vld [vmem:[%s1730_s12 + $0x8] sm:$0xff]  ;;  %v718_v14 = vld [vmem:[%s1730_s12 + $0x10] sm:$0xff] }
  0x78   :  { %1054 = vmatmul.mubr.msk.f32.vlgmr.msra.gmra.mrb[0].mxu0 %vm150_vm0, %v136_v7  ;;  %v514_v7 = vld [vmem:[#allocation9 + $0x18] sm:$0xff]  ;;  %v967_v12 = vld [vmem:[%s1726_s8] ss:$0 sm:$0xff] }
  0x79   :  { %1056 = vmatprep.mubr.msk.f32.mxu0 %vm150_vm0, %v137_v8  ;;  %1177 = vmatpush3.bf16.msra.mxu0 %v1176_v24  ;;  %v1191_v8 = vpack.c.bf16 %v514_v7, %v513_v6  ;;  %v719_v15 = vld [vmem:[%s1730_s12 + $0x18] sm:$0xff]  ;;  %v720_v24 = vld [vmem:[%s1730_s12 + $0x20] sm:$0xff] }
  0x7a   :  { %1178 = vmatprep.subr.bf16.mxu0 %v1393_v13  ;;  %v840_v55 = vld [vmem:[%s1732_s14 + $0x38] sm:$0xff]  ;;  %v980_v6 = vld [vmem:[%s1733_s15] ss:$0 sm:$0xff] }
  0x7c   :  { %1057 = vmatmul.mubr.msk.f32.gmra.mrb[2].mxu0 %vm150_vm0, %v138_v9  ;;  %v716_v9 = vld [vmem:[%s1730_s12] sm:$0xff] }
  0x7d   :  { %1078 = vmatprep.mubr.msk.f32.mxu0 %vm1394_vm1, %v1395_v17  ;;  %1180 = vmatpush3.bf16.msra.mxu0 %v1179_v40  ;;  %v1201_v11 = vpack.c.bf16 %v717_v10, %v716_v9  ;;  %v974_v40 = vld [vmem:[%s1729_s11] ss:$0 sm:$0xff] }
  0x7e   :  { %1187 = vmatprep.subr.bf16.mxu0 %v1393_v13 }
 0x14b   :  { %v1055_v19 = vpop.f32.mrb[0].mxu0 }
 0x14c   :  { %v235_v22 = vadd.f32 %v1055_v19, %v958_v18  ;;  %v229_v23 = vpop.f32.mrb[1].mxu0  ;;  %v1205_v19 = vpack.c.bf16 %v719_v15, %v718_v14 }
 0x14d   :  { %v230_v25 = vadd.f32 %v958_v18, %v229_v23 }
 0x14e   :  { %v249_v26 = vmax.f32 %v235_v22, 0.0 }
 0x14f   :  { %v248_v27 = vmax.f32 %v230_v25, 0.0  ;;  %v1058_v28 = vpop.f32.mrb[2].mxu0  ;;  %v721_v25 = vld [vmem:[%s1730_s12 + $0x28] sm:$0xff] }
 0x150   :  { %v239_v29 = vpop.f32.mrb[3].mxu0  ;;  %v245_v31 = vadd.f32 %v1058_v28, %v958_v18  ;;  %v723_v28 = vld [vmem:[%s1730_s12 + $0x38] sm:$0xff] }
 0x151   :  { %v252_v30 = vadd.f32 %v249_v26, %v248_v27  ;;  %v240_v32 = vadd.f32 %v958_v18, %v239_v29  ;;  %596 = vrot.lane.b32.xlu0 %v248_v27, %s1396_s29  ;;  %v722_v27 = vld [vmem:[%s1730_s12 + $0x30] sm:$0xff] }
 0x152   :  { %v251_v34 = vmax.f32 %v245_v31, 0.0  ;;  %v1213_v29 = vpack.c.bf16 %v723_v28, %v722_v27  ;;  %v834_v31 = vld [vmem:[%s1732_s14 + $0x8] sm:$0xff] }
 0x153   :  { %v250_v33 = vmax.f32 %v240_v32, 0.0  ;;  %v835_v32 = vld [vmem:[%s1732_s14 + $0x10] sm:$0xff] }
 0x155   :  { %v253_v35 = vadd.f32 %v252_v30, %v250_v33  ;;  %600 = vrot.lane.b32.xlu1 %v250_v33, %s1396_s29  ;;  %598 = vrot.lane.b32.xlu0 %v249_v26, %s1396_s29  ;;  %v1209_v26 = vpack.c.bf16 %v721_v25, %v720_v24  ;;  %v833_v30 = vld [vmem:[%s1732_s14] sm:$0xff] }
 0x156   :  { %v1217_v33 = vpack.c.bf16 %v834_v31, %v833_v30 }
 0x157   :  { %v254_v36 = vadd.f32 %v253_v35, %v251_v34 }
 0x159   :  { %v255_v37 = vmul.f32 0.25, %v254_v36  ;;  %602 = vrot.lane.b32.xlu1 %v251_v34, %s1396_s29  ;;  %v836_v34 = vld [vmem:[%s1732_s14 + $0x18] sm:$0xff]  ;;  %v837_v36 = vld [vmem:[%s1732_s14 + $0x20] sm:$0xff] }
 0x15a   :  { %v1221_v35 = vpack.c.bf16 %v836_v34, %v835_v32 }
 0x15b   :  { %1068 = vmatmul.mubr.msk.f32.vlgmr.msra.gmra.mrb[0].mxu1 %vm150_vm0, %v255_v37  ;;  %v838_v37 = vld [vmem:[%s1732_s14 + $0x28] sm:$0xff] }
 0x15c   :  { %1089 = vmatprep.mubr.msk.f32.mxu1 %vm1394_vm1, %v1395_v17  ;;  %1183 = vmatpush3.bf16.msra.mxu1 %v1182_v43  ;;  %v1225_v38 = vpack.c.bf16 %v838_v37, %v837_v36 }
 0x15d   :  { %1184 = vmatprep.subr.bf16.mxu1 %v1393_v13 }
 0x160   :  { %1186 = vmatpush3.bf16.msra.mxu1 %v1185_v51 }
 0x161   :  { %1194 = vmatprep.subr.bf16.mxu1 %v1193_v54 }
 0x1c3   :  { %v597_v2 = vpop.permute.xlu0 %596 }
 0x1c7   :  { %v601_v3 = vpop.permute.xlu1 %600  ;;  %v599_v4 = vpop.permute.xlu0 %598 }
 0x1cb   :  { %v603_v5 = vpop.permute.xlu1 %602 }
 0x22e   :  { %v336_v45 = vpop.f32.mrb[0].mxu1 }
 0x22f   :  { %v337_v46 = vadd.f32 %v963_v44, %v336_v45  ;;  %v1069_v47 = vpop.f32.mrb[1].mxu1 }
 0x231   :  { %v340_v48 = vmax.f32 %v337_v46, 0.0 }
 0x233   :  { %1079 = vmatmul.mubr.msk.f32.vlgmr.msra.gmra.mrb[4].mxu0 %vm150_vm0, %v340_v48 }
 0x234   :  { %1100 = vmatprep.mubr.msk.f32.mxu0 %vm1394_vm1, %v1395_v17  ;;  %1189 = vmatpush3.bf16.msra.mxu0 %v1188_v57  ;;  %v975_v57 = vld [vmem:[%s1731_s13] ss:$0 sm:$0xff] }
 0x235   :  { %1190 = vmatprep.subr.bf16.mxu0 %v1393_v13 }
 0x238   :  { %1192 = vmatpush3.bf16.msra.mxu0 %v1191_v8 }
 0x239   :  { %1202 = vmatprep.subr.bf16.mxu0 %v1201_v11 }
 0x306   :  { %v421_v59 = vpop.f32.mrb[4].mxu0 }
 0x307   :  { %v422_v62 = vadd.f32 %v965_v58, %v421_v59  ;;  %v1080_v63 = vpop.f32.mrb[5].mxu0 }
 0x309   :  { %v425_v0 = vmax.f32 %v422_v62, 0.0 }
 0x30b   :  { %1090 = vmatmul.mubr.msk.f32.vlgmr.msra.gmra.mrb[2].mxu1 %vm150_vm0, %v425_v0 }
 0x30c   :  { %1196 = vmatpush3.bf16.msra.mxu1 %v1193_v54  ;;  %1111 = vmatprep.mubr.msk.f32.mxu1 %vm150_vm0, %v597_v2  ;;  %v839_v54 = vld [vmem:[%s1732_s14 + $0x30] sm:$0xff] }
 0x30d   :  { %1198 = vmatprep.subr.bf16.mxu1 %v1197_v1  ;;  %v1229_v56 = vpack.c.bf16 %v840_v55, %v839_v54 }
 0x310   :  { %1200 = vmatpush3.bf16.msra.mxu1 %v1197_v1 }
 0x311   :  { %1218 = vmatprep.subr.bf16.mxu1 %v1217_v33 }
 0x313   :  { %1112 = vmatmul.mubr.msk.f32.vlgmr.msra.gmra.mrb[4].mxu1 %vm150_vm0, %v599_v4 }
 0x314   :  { %1114 = vmatprep.mubr.msk.f32.mxu1 %vm150_vm0, %v601_v3  ;;  %1220 = vmatpush3.bf16.msra.mxu1 %v1217_v33 }
 0x315   :  { %1222 = vmatprep.subr.bf16.mxu1 %v1221_v35 }
 0x317   :  { %1115 = vmatmul.mubr.msk.f32.gmra.mrb[6].mxu1 %vm150_vm0, %v603_v5 }
 0x318   :  { %1224 = vmatpush3.bf16.msra.mxu1 %v1221_v35 }
 0x319   :  { %1226 = vmatprep.subr.bf16.mxu1 %v1225_v38 }
 0x31c   :  { %1228 = vmatpush3.bf16.msra.mxu1 %v1225_v38 }
 0x31d   :  { %1230 = vmatprep.subr.bf16.mxu1 %v1229_v56 }
 0x320   :  { %1232 = vmatpush3.bf16.msra.mxu1 %v1229_v56 }
 0x3de   :  { %v506_v13 = vpop.f32.mrb[2].mxu1 }
 0x3df   :  { %v507_v16 = vadd.f32 %v967_v12, %v506_v13  ;;  %v1091_v17 = vpop.f32.mrb[3].mxu1 }
 0x3e1   :  { %v510_v18 = vmax.f32 %v507_v16, 0.0 }
 0x3e3   :  { %1101 = vmatmul.mubr.msk.f32.vlgmr.msra.gmra.mrb[6].mxu0 %vm150_vm0, %v510_v18 }
 0x3e4   :  { %1204 = vmatpush3.bf16.msra.mxu0 %v1201_v11 }
 0x3e5   :  { %1206 = vmatprep.subr.bf16.mxu0 %v1205_v19 }
 0x3e6   :  { %v1113_v20 = vpop.f32.mrb[4].mxu1 }
 0x3e7   :  { %v678_v21 = vpop.f32.mrb[5].mxu1 }
 0x3e8   :  { %1208 = vmatpush3.bf16.msra.mxu0 %v1205_v19 }
 0x3e9   :  { %1210 = vmatprep.subr.bf16.mxu0 %v1209_v26 }
 0x3ea   :  { %v1116_v22 = vpop.f32.mrb[6].mxu1 }
 0x3eb   :  { %v688_v23 = vpop.f32.mrb[7].mxu1 }
 0x3ec   :  { %1212 = vmatpush3.bf16.msra.mxu0 %v1209_v26 }
 0x3ed   :  { %1214 = vmatprep.subr.bf16.mxu0 %v1213_v29 }
 0x3f0   :  { %1216 = vmatpush3.bf16.msra.mxu0 %v1213_v29 }
 0x4b6   :  { %v584_v39 = vpop.f32.mrb[6].mxu0 }
 0x4b7   :  { %v697_v41 = vadd.f32 %v678_v21, %v584_v39  ;;  %v698_v42 = vadd.f32 %v1113_v20, %v584_v39  ;;  %v699_v43 = vadd.f32 %v688_v23, %v584_v39  ;;  %v700_v44 = vadd.f32 %v1116_v22, %v584_v39  ;;  %v1102_v45 = vpop.f32.mrb[7].mxu0 }
 0x4b9   :  { %v708_v46 = vadd.f32 %v974_v40, %v697_v41  ;;  %v709_v47 = vadd.f32 %v974_v40, %v698_v42  ;;  %v710_v48 = vadd.f32 %v974_v40, %v699_v43  ;;  %v711_v51 = vadd.f32 %v974_v40, %v700_v44 }
 0x4bb   :  { %v713_v49 = vmax.f32 %v709_v47, 0.0  ;;  %v712_v50 = vmax.f32 %v708_v46, 0.0  ;;  %v714_v52 = vmax.f32 %v710_v48, 0.0  ;;  %v715_v53 = vmax.f32 %v711_v51, 0.0 }
 0x4bd   :  { %1133 = vmatprep.mubr.msk.f32.mxu0 %vm731_vm2, %v712_v50 }
 0x4be   :  { %1134 = vmatmul.mubr.msk.f32.vlgmr.msra.gmra.mrb[8].mxu0 %vm731_vm2, %v713_v49 }
 0x4bf   :  { %1136 = vmatprep.mubr.msk.f32.mxu0 %vm731_vm2, %v714_v52 }
 0x4c2   :  { %1137 = vmatmul.mubr.msk.f32.gmra.mrb[10].mxu0 %vm731_vm2, %v715_v53 }
 0x591   :  { %v1135_v58 = vpop.f32.mrb[8].mxu0 }
 0x592   :  { %v816_v59 = vadd.f32 %v1135_v58, %v975_v57  ;;  %v810_v60 = vpop.f32.mrb[9].mxu0 }
 0x593   :  { %v811_v61 = vadd.f32 %v975_v57, %v810_v60 }
 0x594   :  { %v830_v0 = vmax.f32 %v816_v59, 0.0 }
 0x595   :  { %v829_v62 = vmax.f32 %v811_v61, 0.0  ;;  %v1138_v63 = vpop.f32.mrb[10].mxu0 }
 0x596   :  { %v826_v1 = vadd.f32 %v1138_v63, %v975_v57  ;;  %v820_v2 = vpop.f32.mrb[11].mxu0 }
 0x597   :  { %v821_v3 = vadd.f32 %v975_v57, %v820_v2  ;;  %1155 = vmatprep.mubr.msk.f32.mxu1 %vm731_vm2, %v829_v62 }
 0x598   :  { %1156 = vmatmul.mubr.msk.f32.vlgmr.msra.gmra.mrb[8].mxu1 %vm731_vm2, %v830_v0  ;;  %v832_v5 = vmax.f32 %v826_v1, 0.0 }
 0x599   :  { %v831_v4 = vmax.f32 %v821_v3, 0.0 }
 0x59b   :  { %1158 = vmatprep.mubr.msk.f32.mxu1 %vm731_vm2, %v831_v4 }
 0x59c   :  { %1159 = vmatmul.mubr.msk.f32.gmra.mrb[10].mxu1 %vm731_vm2, %v832_v5 }
 0x66b   :  { %v1157_v7 = vpop.f32.mrb[8].mxu1 }
 0x66c   :  { %v932_v8 = vadd.f32 %v1157_v7, %v980_v6  ;;  %v926_v9 = vpop.f32.mrb[9].mxu1 }
 0x66d   :  { %v927_v10 = vadd.f32 %v980_v6, %v926_v9 }
 0x66e   :  { %947 = vst.msk [vmem:[%s1734_s16 + $0x8] sm:$0xff] %vm945_vm3, %v932_v8 }
 0x66f   :  { %946 = vst.msk [vmem:[%s1734_s16] sm:$0xff] %vm945_vm3, %v927_v10  ;;  %v1160_v11 = vpop.f32.mrb[10].mxu1 }
 0x670   :  { %v942_v12 = vadd.f32 %v1160_v11, %v980_v6  ;;  %v936_v13 = vpop.f32.mrb[11].mxu1 }
 0x671   :  { %v937_v14 = vadd.f32 %v980_v6, %v936_v13 }
 0x672   :  { %949 = vst.msk [vmem:[%s1734_s16 + $0x18] sm:$0xff] %vm945_vm3, %v942_v12 }
 0x673   :  { %948 = vst.msk [vmem:[%s1734_s16 + $0x10] sm:$0xff] %vm945_vm3, %v937_v14 }
 0x674   :  { %954 = vsyncpa [#allocation3], 1 }
 0x675   :  { %955 = vsyncpa [#allocation5], 1 }
 0x676   :  { %956 = vsyncpa [#allocation8], 1 }
 0x677   :  { %957 = vsyncpa [#allocation11], 1 }

// kernel: tpu_custom_call.1
= control target key start
LH: loop header
LB: loop body
LE: loop exit
PB: predicated region body
PF: predicated region fallthrough
CT: control target
= control target key end

     0   :  { %s1718_s0 = inlined_call_operand.vmem [shape: f32[32,32], index: 0, kind: input, shape index: {}]   ;;  %s1719_s1 = inlined_call_operand.hbm [shape: f32[32,64], index: 1, kind: input, shape index: {}]   ;;  %s1720_s2 = inlined_call_operand.vmem [shape: f32[1,64], index: 2, kind: input, shape index: {}]   ;;  %s1721_s3 = inlined_call_operand.hbm [shape: f32[32,32], index: 3, kind: input, shape index: {}]   ;;  %s1722_s4 = inlined_call_operand.vmem [shape: f32[1,32], index: 4, kind: input, shape index: {}]   ;;  %s1723_s5 = inlined_call_operand.hbm [shape: f32[32,32], index: 5, kind: input, shape index: {}]   ;;  %s1724_s6 = inlined_call_operand.vmem [shape: f32[1,32], index: 6, kind: input, shape index: {}]   ;;  %s1725_s7 = inlined_call_operand.hbm [shape: f32[32,32], index: 7, kind: input, shape index: {}]   ;;  %s1726_s8 = inlined_call_operand.vmem [shape: f32[1,32], index: 8, kind: input, shape index: {}]   ;;  %s1727_s9 = inlined_call_operand.hbm [shape: f32[32,64], index: 9, kind: input, shape index: {}]   ;;  %s1728_s10 = inlined_call_operand.hbm [shape: f32[32,64], index: 10, kind: input, shape index: {}]   ;;  %s1729_s11 = inlined_call_operand.vmem [shape: f32[1,64], index: 11, kind: input, shape index: {}]   ;;  %s1730_s12 = inlined_call_operand.vmem [shape: f32[64,64], index: 12, kind: input, shape index: {}]   ;;  %s1731_s13 = inlined_call_operand.vmem [shape: f32[1,64], index: 13, kind: input, shape index: {}]   ;;  %s1732_s14 = inlined_call_operand.vmem [shape: f32[64,8], index: 14, kind: input, shape index: {}]   ;;  %s1733_s15 = inlined_call_operand.vmem [shape: f32[1,8], index: 15, kind: input, shape index: {}]   ;;  %s1734_s16 = inlined_call_operand.vmem [shape: f32[32,8], index: 16, kind: output, shape index: {}]  }
   0x1   :  { %1736 = sst [smem:[#allocation16_spill]] %s1718_s0 }
   0x2   :  { %21 = vsyncpa [#allocation3], 0 }
   0x3   :  { %22 = vsyncpa [#allocation5], 0 }
   0x4   :  { %23 = vsyncpa [#allocation8], 0 }
   0x5   :  { %24 = vsyncpa [#allocation11], 0  ;;  %s1385_s21 = smov [#allocation4]   ;;  %s1386_s23 = smov [#allocation7]  }
   0x6   :  { %s46_s22 = sshll.u32 %s1385_s21, 4  ;;  %s74_s24 = sshll.u32 %s1386_s23, 4  ;;  %s47_s22 = int_to_ptr.vmem [resolvable:$true] %s46_s22  ;;  %s1482_s24 = int_to_ptr.vmem [resolvable:$true] %s74_s24 }
   0x7   :  { %s1245_s27 = scalar_lea.hbm %s1721_s3, 512 }
   0x8   :  { %p1246_p0 = scmp.ne.s32.totalorder %s1721_s3, %s1245_s27  ;;  %p1249_p1 = scmp.lt.u32.totalorder %s1245_s27, %s1721_s3 }
   0xa   :  { %p1251_p2 = pnand %p1249_p1, %p1246_p0 }
   0xc   :  { %1254 = shalt.err (!%p1251_p2)
}
   0xd   :  { %s1255_s17 = scalar_lea.vmem %s47_s22, 512  ;;  %p1260_p4 = scmp.lt.s32.totalorder %s47_s22, %s47_s22 }
   0xe   :  { %p1256_p3 = scmp.ne.s32.totalorder %s47_s22, %s1255_s17  ;;  %p1261_p5 = scmp.lt.s32.totalorder %s1255_s17, %s1255_s17 }
  0x10   :  { %p1262_p6 = por %p1261_p5, %p1260_p4 }
  0x12   :  { %p1263_p7 = pnand %p1262_p6, %p1256_p3 }
  0x14   :  { %1266 = shalt.err (!%p1263_p7)
}
  0x15   :  { %s1387_s18 = smov 128   ;;  %s1388_s19 = smov 8  }
  0x16   :  { %52 = dma.hbm_to_vmem [thread:$0]  %s1721_s3, 512, %s47_s22, [#allocation5], %s1387_s18, %s1387_s18, %s1388_s19  }
  0x17   :  { %s1267_s26 = scalar_lea.hbm %s1725_s7, 512 }
  0x18   :  { %p1268_p8 = scmp.ne.s32.totalorder %s1725_s7, %s1267_s26  ;;  %p1271_p9 = scmp.lt.u32.totalorder %s1267_s26, %s1725_s7 }
  0x1a   :  { %p1273_p10 = pnand %p1271_p9, %p1268_p8 }
  0x1c   :  { %1276 = shalt.err (!%p1273_p10)
}
  0x1d   :  { %s1277_s0 = scalar_lea.vmem %s1482_s24, 512  ;;  %p1282_p12 = scmp.lt.s32.totalorder %s1482_s24, %s1482_s24 }
  0x1e   :  { %p1278_p11 = scmp.ne.s32.totalorder %s1482_s24, %s1277_s0  ;;  %p1283_p13 = scmp.lt.s32.totalorder %s1277_s0, %s1277_s0 }
  0x20   :  { %p1284_p0 = por %p1283_p13, %p1282_p12 }
  0x22   :  { %p1285_p1 = pnand %p1284_p0, %p1278_p11 }
  0x24   :  { %1288 = shalt.err (!%p1285_p1)
}
  0x25   :  { %80 = dma.hbm_to_vmem [thread:$0]  %s1725_s7, 512, %s1482_s24, [#allocation8], %s1387_s18, %s1387_s18, %s1388_s19  }
  0x26   :  { %s1389_s17 = smov [#allocation2]   ;;  %s1390_s21 = smov [#allocation6]  }
  0x27   :  { %s32_s20 = sshll.u32 %s1389_s17, 4  ;;  %s60_s23 = sshll.u32 %s1390_s21, 4  ;;  %s33_s20 = int_to_ptr.vmem [resolvable:$true] %s32_s20  ;;  %s1519_s23 = int_to_ptr.vmem [resolvable:$true] %s60_s23 }
  0x28   :  { %s1289_s27 = scalar_lea.hbm %s1719_s1, 512 }
  0x29   :  { %p1290_p2 = scmp.ne.s32.totalorder %s1719_s1, %s1289_s27  ;;  %p1293_p3 = scmp.lt.u32.totalorder %s1289_s27, %s1719_s1 }
  0x2b   :  { %p1295_p4 = pnand %p1293_p3, %p1290_p2 }
  0x2d   :  { %1298 = shalt.err (!%p1295_p4)
}
  0x2e   :  { %s1299_s7 = scalar_lea.vmem %s33_s20, 512  ;;  %p1304_p6 = scmp.lt.s32.totalorder %s33_s20, %s33_s20 }
  0x2f   :  { %p1300_p5 = scmp.ne.s32.totalorder %s33_s20, %s1299_s7  ;;  %p1305_p7 = scmp.lt.s32.totalorder %s1299_s7, %s1299_s7 }
  0x31   :  { %p1306_p8 = por %p1305_p7, %p1304_p6 }
  0x33   :  { %p1307_p9 = pnand %p1306_p8, %p1300_p5 }
  0x35   :  { %1310 = shalt.err (!%p1307_p9)
}
  0x36   :  { %38 = dma.hbm_to_vmem [thread:$0]  %s1719_s1, 512, %s33_s20, [#allocation3], %s1387_s18, %s1387_s18, %s1388_s19  }
  0x37   :  { %s1311_s21 = scalar_lea.hbm %s1723_s5, 512 }
  0x38   :  { %p1312_p10 = scmp.ne.s32.totalorder %s1723_s5, %s1311_s21  ;;  %p1315_p11 = scmp.lt.u32.totalorder %s1311_s21, %s1723_s5 }
  0x3a   :  { %p1317_p12 = pnand %p1315_p11, %p1312_p10 }
  0x3c   :  { %1320 = shalt.err (!%p1317_p12)
}
  0x3d   :  { %s1321_s29 = scalar_lea.vmem %s1519_s23, 512  ;;  %p1326_p0 = scmp.lt.s32.totalorder %s1519_s23, %s1519_s23 }
  0x3e   :  { %p1322_p13 = scmp.ne.s32.totalorder %s1519_s23, %s1321_s29  ;;  %p1327_p1 = scmp.lt.s32.totalorder %s1321_s29, %s1321_s29 }
  0x40   :  { %p1328_p2 = por %p1327_p1, %p1326_p0 }
  0x42   :  { %p1329_p3 = pnand %p1328_p2, %p1322_p13 }
  0x44   :  { %1332 = shalt.err (!%p1329_p3)
}
  0x45   :  { %66 = dma.hbm_to_vmem [thread:$0]  %s1723_s5, 512, %s1519_s23, [#allocation5], %s1387_s18, %s1387_s18, %s1388_s19  }
  0x46   :  { %s1391_s30 = smov [#allocation9]   ;;  %s1392_s7 = smov [#allocation10]  }
  0x47   :  { %s88_s0 = sshll.u32 %s1391_s30, 4  ;;  %s100_s24 = sshll.u32 %s1392_s7, 4  ;;  %s89_s0 = int_to_ptr.vmem [resolvable:$true] %s88_s0  ;;  %s1556_s24 = int_to_ptr.vmem [resolvable:$true] %s100_s24 }
  0x48   :  { %s1333_s17 = scalar_lea.hbm %s1727_s9, 512 }
  0x49   :  { %p1334_p4 = scmp.ne.s32.totalorder %s1727_s9, %s1333_s17  ;;  %p1337_p5 = scmp.lt.u32.totalorder %s1333_s17, %s1727_s9 }
  0x4b   :  { %p1339_p6 = pnand %p1337_p5, %p1334_p4 }
  0x4d   :  { %1342 = shalt.err (!%p1339_p6)
}
  0x4e   :  { %s1343_s5 = scalar_lea.vmem %s89_s0, 512  ;;  %p1348_p8 = scmp.lt.s32.totalorder %s89_s0, %s89_s0 }
  0x4f   :  { %p1344_p7 = scmp.ne.s32.totalorder %s89_s0, %s1343_s5  ;;  %p1349_p9 = scmp.lt.s32.totalorder %s1343_s5, %s1343_s5 }
  0x51   :  { %p1350_p10 = por %p1349_p9, %p1348_p8 }
  0x53   :  { %p1351_p11 = pnand %p1350_p10, %p1344_p7 }
  0x55   :  { %1354 = shalt.err (!%p1351_p11)
}
  0x56   :  { %94 = dma.hbm_to_vmem [thread:$0]  %s1727_s9, 512, %s89_s0, [#allocation8], %s1387_s18, %s1387_s18, %s1388_s19  }
  0x57   :  { %s1355_s20 = scalar_lea.hbm %s1728_s10, 512 }
  0x58   :  { %p1356_p12 = scmp.ne.s32.totalorder %s1728_s10, %s1355_s20  ;;  %p1359_p13 = scmp.lt.u32.totalorder %s1355_s20, %s1728_s10 }
  0x5a   :  { %p1361_p0 = pnand %p1359_p13, %p1356_p12 }
  0x5c   :  { %1364 = shalt.err (!%p1361_p0)
}
  0x5d   :  { %s1365_s17 = scalar_lea.vmem %s1556_s24, 512  ;;  %p1370_p2 = scmp.lt.s32.totalorder %s1556_s24, %s1556_s24 }
  0x5e   :  { %p1366_p1 = scmp.ne.s32.totalorder %s1556_s24, %s1365_s17  ;;  %p1371_p3 = scmp.lt.s32.totalorder %s1365_s17, %s1365_s17 }
  0x60   :  { %p1372_p4 = por %p1371_p3, %p1370_p2 }
  0x62   :  { %p1373_p5 = pnand %p1372_p4, %p1366_p1 }
  0x64   :  { %1376 = shalt.err (!%p1373_p5)
}
  0x65   :  { %106 = dma.hbm_to_vmem [thread:$0]  %s1728_s10, 512, %s1556_s24, [#allocation11], %s1387_s18, %s1387_s18, %s1388_s19  }
  0x66   :  { %1377 = dma.done.wait [#allocation3], 512  }
  0x67   :  { %1378 = vsyncadd [#allocation3], 4294966784 }
  0x68   :  { %1379 = dma.done.wait [#allocation5], 1024  }
  0x69   :  { %1380 = vsyncadd [#allocation5], 4294966272 }
  0x6a   :  { %1381 = dma.done.wait [#allocation8], 1024  }
  0x6b   :  { %1382 = vsyncadd [#allocation8], 4294966272 }
  0x6c   :  { %1383 = dma.done.wait [#allocation11], 512  }
  0x6d   :  { %1384 = vsyncadd [#allocation11], 4294966784  ;;  %vm150_vm0 = vcmask 261120   ;;  %v139_v0 = vld [vmem:[#allocation2] sm:$0xff]  ;;  %v140_v1 = vld [vmem:[#allocation2 + $0x8] sm:$0xff]  ;;  %s1737_s26 = sld [smem:[#allocation16_spill]] }
  0x6e   :  { %v141_v2 = vld [vmem:[#allocation2 + $0x10] sm:$0xff]  ;;  %v1161_v3 = vpack.c.bf16 %v140_v1, %v139_v0  ;;  %v142_v4 = vld [vmem:[#allocation2 + $0x18] sm:$0xff]  ;;  %v256_v10 = vld [vmem:[#allocation4] sm:$0xff]  ;;  %v1393_v13 = vmov 0.0|0.0   ;;  %vm1394_vm1 = vmmov 0   ;;  %v1395_v17 = vmov 0.0  }
  0x6f   :  { %v1165_v6 = vpack.c.bf16 %v142_v4, %v141_v2  ;;  %v257_v11 = vld [vmem:[#allocation4 + $0x8] sm:$0xff]  ;;  %1169 = vmatprep.subr.bf16.mxu1 %v1393_v13  ;;  %v258_v14 = vld [vmem:[#allocation4 + $0x10] sm:$0xff]  ;;  %v259_v15 = vld [vmem:[#allocation4 + $0x18] sm:$0xff]  ;;  %1067 = vmatprep.mubr.msk.f32.mxu1 %vm1394_vm1, %v1395_v17  ;;  %s1396_s29 = smov 96   ;;  %vm731_vm2 = vcmask 523264   ;;  %vm945_vm3 = vcmask 64512  }
  0x70   :  { %1162 = vmatprep.subr.bf16.mxu0 %v1161_v3  ;;  %v1170_v12 = vpack.c.bf16 %v257_v11, %v256_v10  ;;  %v1173_v16 = vpack.c.bf16 %v259_v15, %v258_v14  ;;  %v958_v18 = vld [vmem:[%s1720_s2] ss:$0 sm:$0xff]  ;;  %v342_v21 = vld [vmem:[#allocation6 + $0x8] sm:$0xff]  ;;  %v343_v38 = vld [vmem:[#allocation6 + $0x10] sm:$0xff] }
  0x71   :  { %1164 = vmatpush3.bf16.msra.mxu0 %v1161_v3  ;;  %v341_v20 = vld [vmem:[#allocation6] sm:$0xff]  ;;  %v344_v39 = vld [vmem:[#allocation6 + $0x18] sm:$0xff]  ;;  %v427_v42 = vld [vmem:[#allocation7 + $0x8] sm:$0xff] }
  0x72   :  { %1166 = vmatprep.subr.bf16.mxu0 %v1165_v6  ;;  %1171 = vmatpush3.bf16.msra.mxu1 %v1170_v12  ;;  %v1176_v24 = vpack.c.bf16 %v342_v21, %v341_v20  ;;  %v1179_v40 = vpack.c.bf16 %v344_v39, %v343_v38  ;;  %v426_v41 = vld [vmem:[#allocation7] sm:$0xff]  ;;  %v428_v49 = vld [vmem:[#allocation7 + $0x10] sm:$0xff]  ;;  %v429_v50 = vld [vmem:[#allocation7 + $0x18] sm:$0xff] }
  0x73   :  { %v135_v5 = vld [vmem:[%s1737_s26] sm:$0xff]  ;;  %v136_v7 = vld [vmem:[%s1737_s26 + $0x8] sm:$0xff]  ;;  %v137_v8 = vld [vmem:[%s1737_s26 + $0x10] sm:$0xff]  ;;  %1172 = vmatprep.subr.bf16.mxu1 %v1393_v13  ;;  %v1182_v43 = vpack.c.bf16 %v427_v42, %v426_v41  ;;  %v1185_v51 = vpack.c.bf16 %v429_v50, %v428_v49 }
  0x74   :  { %1053 = vmatprep.mubr.msk.f32.mxu0 %vm150_vm0, %v135_v5  ;;  %v138_v9 = vld [vmem:[%s1737_s26 + $0x18] sm:$0xff]  ;;  %v963_v44 = vld [vmem:[%s1722_s4] ss:$0 sm:$0xff]  ;;  %v589_v53 = vld [vmem:[#allocation10 + $0x8] sm:$0xff] }
  0x75   :  { %1168 = vmatpush3.bf16.msra.mxu0 %v1165_v6  ;;  %v588_v52 = vld [vmem:[#allocation10] sm:$0xff]  ;;  %v512_v56 = vld [vmem:[#allocation9 + $0x8] sm:$0xff]  ;;  %v590_v60 = vld [vmem:[#allocation10 + $0x10] sm:$0xff] }
  0x76   :  { %1175 = vmatprep.subr.bf16.mxu0 %v1393_v13  ;;  %1174 = vmatpush3.bf16.msra.mxu1 %v1173_v16  ;;  %v1193_v54 = vpack.c.bf16 %v589_v53, %v588_v52  ;;  %v511_v55 = vld [vmem:[#allocation9] sm:$0xff]  ;;  %v591_v61 = vld [vmem:[#allocation10 + $0x18] sm:$0xff]  ;;  %v513_v6 = vld [vmem:[#allocation9 + $0x10] sm:$0xff] }
  0x77   :  { %1181 = vmatprep.subr.bf16.mxu1 %v1393_v13  ;;  %v1188_v57 = vpack.c.bf16 %v512_v56, %v511_v55  ;;  %v965_v58 = vld [vmem:[%s1724_s6] ss:$0 sm:$0xff]  ;;  %v1197_v1 = vpack.c.bf16 %v591_v61, %v590_v60  ;;  %v717_v10 = vld [vmem:[%s1730_s12 + $0x8] sm:$0xff]  ;;  %v718_v14 = vld [vmem:[%s1730_s12 + $0x10] sm:$0xff] }
  0x78   :  { %1054 = vmatmul.mubr.msk.f32.vlgmr.msra.gmra.mrb[0].mxu0 %vm150_vm0, %v136_v7  ;;  %v514_v7 = vld [vmem:[#allocation9 + $0x18] sm:$0xff]  ;;  %v967_v12 = vld [vmem:[%s1726_s8] ss:$0 sm:$0xff] }
  0x79   :  { %1056 = vmatprep.mubr.msk.f32.mxu0 %vm150_vm0, %v137_v8  ;;  %1177 = vmatpush3.bf16.msra.mxu0 %v1176_v24  ;;  %v1191_v8 = vpack.c.bf16 %v514_v7, %v513_v6  ;;  %v719_v15 = vld [vmem:[%s1730_s12 + $0x18] sm:$0xff]  ;;  %v720_v24 = vld [vmem:[%s1730_s12 + $0x20] sm:$0xff] }
  0x7a   :  { %1178 = vmatprep.subr.bf16.mxu0 %v1393_v13  ;;  %v840_v55 = vld [vmem:[%s1732_s14 + $0x38] sm:$0xff]  ;;  %v980_v6 = vld [vmem:[%s1733_s15] ss:$0 sm:$0xff] }
  0x7c   :  { %1057 = vmatmul.mubr.msk.f32.gmra.mrb[2].mxu0 %vm150_vm0, %v138_v9  ;;  %v716_v9 = vld [vmem:[%s1730_s12] sm:$0xff] }
  0x7d   :  { %1078 = vmatprep.mubr.msk.f32.mxu0 %vm1394_vm1, %v1395_v17  ;;  %1180 = vmatpush3.bf16.msra.mxu0 %v1179_v40  ;;  %v1201_v11 = vpack.c.bf16 %v717_v10, %v716_v9  ;;  %v974_v40 = vld [vmem:[%s1729_s11] ss:$0 sm:$0xff] }
  0x7e   :  { %1187 = vmatprep.subr.bf16.mxu0 %v1393_v13 }
 0x14b   :  { %v1055_v19 = vpop.f32.mrb[0].mxu0 }
 0x14c   :  { %v235_v22 = vadd.f32 %v1055_v19, %v958_v18  ;;  %v229_v23 = vpop.f32.mrb[1].mxu0  ;;  %v1205_v19 = vpack.c.bf16 %v719_v15, %v718_v14 }
 0x14d   :  { %v230_v25 = vadd.f32 %v958_v18, %v229_v23 }
 0x14e   :  { %v249_v26 = vmax.f32 %v235_v22, 0.0 }
 0x14f   :  { %v248_v27 = vmax.f32 %v230_v25, 0.0  ;;  %v1058_v28 = vpop.f32.mrb[2].mxu0  ;;  %v721_v25 = vld [vmem:[%s1730_s12 + $0x28] sm:$0xff] }
 0x150   :  { %v239_v29 = vpop.f32.mrb[3].mxu0  ;;  %v245_v31 = vadd.f32 %v1058_v28, %v958_v18  ;;  %v723_v28 = vld [vmem:[%s1730_s12 + $0x38] sm:$0xff] }
 0x151   :  { %v252_v30 = vadd.f32 %v249_v26, %v248_v27  ;;  %v240_v32 = vadd.f32 %v958_v18, %v239_v29  ;;  %596 = vrot.lane.b32.xlu0 %v248_v27, %s1396_s29  ;;  %v722_v27 = vld [vmem:[%s1730_s12 + $0x30] sm:$0xff] }
 0x152   :  { %v251_v34 = vmax.f32 %v245_v31, 0.0  ;;  %v1213_v29 = vpack.c.bf16 %v723_v28, %v722_v27  ;;  %v834_v31 = vld [vmem:[%s1732_s14 + $0x8] sm:$0xff] }
 0x153   :  { %v250_v33 = vmax.f32 %v240_v32, 0.0  ;;  %v835_v32 = vld [vmem:[%s1732_s14 + $0x10] sm:$0xff] }
 0x155   :  { %v253_v35 = vadd.f32 %v252_v30, %v250_v33  ;;  %600 = vrot.lane.b32.xlu1 %v250_v33, %s1396_s29  ;;  %598 = vrot.lane.b32.xlu0 %v249_v26, %s1396_s29  ;;  %v1209_v26 = vpack.c.bf16 %v721_v25, %v720_v24  ;;  %v833_v30 = vld [vmem:[%s1732_s14] sm:$0xff] }
 0x156   :  { %v1217_v33 = vpack.c.bf16 %v834_v31, %v833_v30 }
 0x157   :  { %v254_v36 = vadd.f32 %v253_v35, %v251_v34 }
 0x159   :  { %v255_v37 = vmul.f32 0.25, %v254_v36  ;;  %602 = vrot.lane.b32.xlu1 %v251_v34, %s1396_s29  ;;  %v836_v34 = vld [vmem:[%s1732_s14 + $0x18] sm:$0xff]  ;;  %v837_v36 = vld [vmem:[%s1732_s14 + $0x20] sm:$0xff] }
 0x15a   :  { %v1221_v35 = vpack.c.bf16 %v836_v34, %v835_v32 }
 0x15b   :  { %1068 = vmatmul.mubr.msk.f32.vlgmr.msra.gmra.mrb[0].mxu1 %vm150_vm0, %v255_v37  ;;  %v838_v37 = vld [vmem:[%s1732_s14 + $0x28] sm:$0xff] }
 0x15c   :  { %1089 = vmatprep.mubr.msk.f32.mxu1 %vm1394_vm1, %v1395_v17  ;;  %1183 = vmatpush3.bf16.msra.mxu1 %v1182_v43  ;;  %v1225_v38 = vpack.c.bf16 %v838_v37, %v837_v36 }
 0x15d   :  { %1184 = vmatprep.subr.bf16.mxu1 %v1393_v13 }
 0x160   :  { %1186 = vmatpush3.bf16.msra.mxu1 %v1185_v51 }
 0x161   :  { %1194 = vmatprep.subr.bf16.mxu1 %v1193_v54 }
 0x1c3   :  { %v597_v2 = vpop.permute.xlu0 %596 }
 0x1c7   :  { %v601_v3 = vpop.permute.xlu1 %600  ;;  %v599_v4 = vpop.permute.xlu0 %598 }
 0x1cb   :  { %v603_v5 = vpop.permute.xlu1 %602 }
 0x22e   :  { %v336_v45 = vpop.f32.mrb[0].mxu1 }
 0x22f   :  { %v337_v46 = vadd.f32 %v963_v44, %v336_v45  ;;  %v1069_v47 = vpop.f32.mrb[1].mxu1 }
 0x231   :  { %v340_v48 = vmax.f32 %v337_v46, 0.0 }
 0x233   :  { %1079 = vmatmul.mubr.msk.f32.vlgmr.msra.gmra.mrb[4].mxu0 %vm150_vm0, %v340_v48 }
 0x234   :  { %1100 = vmatprep.mubr.msk.f32.mxu0 %vm1394_vm1, %v1395_v17  ;;  %1189 = vmatpush3.bf16.msra.mxu0 %v1188_v57  ;;  %v975_v57 = vld [vmem:[%s1731_s13] ss:$0 sm:$0xff] }
 0x235   :  { %1190 = vmatprep.subr.bf16.mxu0 %v1393_v13 }
 0x238   :  { %1192 = vmatpush3.bf16.msra.mxu0 %v1191_v8 }
 0x239   :  { %1202 = vmatprep.subr.bf16.mxu0 %v1201_v11 }
 0x306   :  { %v421_v59 = vpop.f32.mrb[4].mxu0 }
 0x307   :  { %v422_v62 = vadd.f32 %v965_v58, %v421_v59  ;;  %v1080_v63 = vpop.f32.mrb[5].mxu0 }
 0x309   :  { %v425_v0 = vmax.f32 %v422_v62, 0.0 }
 0x30b   :  { %1090 = vmatmul.mubr.msk.f32.vlgmr.msra.gmra.mrb[2].mxu1 %vm150_vm0, %v425_v0 }
 0x30c   :  { %1196 = vmatpush3.bf16.msra.mxu1 %v1193_v54  ;;  %1111 = vmatprep.mubr.msk.f32.mxu1 %vm150_vm0, %v597_v2  ;;  %v839_v54 = vld [vmem:[%s1732_s14 + $0x30] sm:$0xff] }
 0x30d   :  { %1198 = vmatprep.subr.bf16.mxu1 %v1197_v1  ;;  %v1229_v56 = vpack.c.bf16 %v840_v55, %v839_v54 }
 0x310   :  { %1200 = vmatpush3.bf16.msra.mxu1 %v1197_v1 }
 0x311   :  { %1218 = vmatprep.subr.bf16.mxu1 %v1217_v33 }
 0x313   :  { %1112 = vmatmul.mubr.msk.f32.vlgmr.msra.gmra.mrb[4].mxu1 %vm150_vm0, %v599_v4 }
 0x314   :  { %1114 = vmatprep.mubr.msk.f32.mxu1 %vm150_vm0, %v601_v3  ;;  %1220 = vmatpush3.bf16.msra.mxu1 %v1217_v33 }
 0x315   :  { %1222 = vmatprep.subr.bf16.mxu1 %v1221_v35 }
 0x317   :  { %1115 = vmatmul.mubr.msk.f32.gmra.mrb[6].mxu1 %vm150_vm0, %v603_v5 }
 0x318   :  { %1224 = vmatpush3.bf16.msra.mxu1 %v1221_v35 }
 0x319   :  { %1226 = vmatprep.subr.bf16.mxu1 %v1225_v38 }
 0x31c   :  { %1228 = vmatpush3.bf16.msra.mxu1 %v1225_v38 }
 0x31d   :  { %1230 = vmatprep.subr.bf16.mxu1 %v1229_v56 }
 0x320   :  { %1232 = vmatpush3.bf16.msra.mxu1 %v1229_v56 }
 0x3de   :  { %v506_v13 = vpop.f32.mrb[2].mxu1 }
 0x3df   :  { %v507_v16 = vadd.f32 %v967_v12, %v506_v13  ;;  %v1091_v17 = vpop.f32.mrb[3].mxu1 }
 0x3e1   :  { %v510_v18 = vmax.f32 %v507_v16, 0.0 }
 0x3e3   :  { %1101 = vmatmul.mubr.msk.f32.vlgmr.msra.gmra.mrb[6].mxu0 %vm150_vm0, %v510_v18 }
 0x3e4   :  { %1204 = vmatpush3.bf16.msra.mxu0 %v1201_v11 }
 0x3e5   :  { %1206 = vmatprep.subr.bf16.mxu0 %v1205_v19 }
 0x3e6   :  { %v1113_v20 = vpop.f32.mrb[4].mxu1 }
 0x3e7   :  { %v678_v21 = vpop.f32.mrb[5].mxu1 }
 0x3e8   :  { %1208 = vmatpush3.bf16.msra.mxu0 %v1205_v19 }
 0x3e9   :  { %1210 = vmatprep.subr.bf16.mxu0 %v1209_v26 }
 0x3ea   :  { %v1116_v22 = vpop.f32.mrb[6].mxu1 }
 0x3eb   :  { %v688_v23 = vpop.f32.mrb[7].mxu1 }
 0x3ec   :  { %1212 = vmatpush3.bf16.msra.mxu0 %v1209_v26 }
 0x3ed   :  { %1214 = vmatprep.subr.bf16.mxu0 %v1213_v29 }
 0x3f0   :  { %1216 = vmatpush3.bf16.msra.mxu0 %v1213_v29 }
 0x4b6   :  { %v584_v39 = vpop.f32.mrb[6].mxu0 }
 0x4b7   :  { %v697_v41 = vadd.f32 %v678_v21, %v584_v39  ;;  %v698_v42 = vadd.f32 %v1113_v20, %v584_v39  ;;  %v699_v43 = vadd.f32 %v688_v23, %v584_v39  ;;  %v700_v44 = vadd.f32 %v1116_v22, %v584_v39  ;;  %v1102_v45 = vpop.f32.mrb[7].mxu0 }
 0x4b9   :  { %v708_v46 = vadd.f32 %v974_v40, %v697_v41  ;;  %v709_v47 = vadd.f32 %v974_v40, %v698_v42  ;;  %v710_v48 = vadd.f32 %v974_v40, %v699_v43  ;;  %v711_v51 = vadd.f32 %v974_v40, %v700_v44 }
 0x4bb   :  { %v713_v49 = vmax.f32 %v709_v47, 0.0  ;;  %v712_v50 = vmax.f32 %v708_v46, 0.0  ;;  %v714_v52 = vmax.f32 %v710_v48, 0.0  ;;  %v715_v53 = vmax.f32 %v711_v51, 0.0 }
 0x4bd   :  { %1133 = vmatprep.mubr.msk.f32.mxu0 %vm731_vm2, %v712_v50 }
 0x4be   :  { %1134 = vmatmul.mubr.msk.f32.vlgmr.msra.gmra.mrb[8].mxu0 %vm731_vm2, %v713_v49 }
 0x4bf   :  { %1136 = vmatprep.mubr.msk.f32.mxu0 %vm731_vm2, %v714_v52 }
 0x4c2   :  { %1137 = vmatmul.mubr.msk.f32.gmra.mrb[10].mxu0 %vm731_vm2, %v715_v53 }
 0x591   :  { %v1135_v58 = vpop.f32.mrb[8].mxu0 }
 0x592   :  { %v816_v59 = vadd.f32 %v1135_v58, %v975_v57  ;;  %v810_v60 = vpop.f32.mrb[9].mxu0 }
 0x593   :  { %v811_v61 = vadd.f32 %v975_v57, %v810_v60 }
 0x594   :  { %v830_v0 = vmax.f32 %v816_v59, 0.0 }
 0x595   :  { %v829_v62 = vmax.f32 %v811_v61, 0.0  ;;  %v1138_v63 = vpop.f32.mrb[10].mxu0 }
 0x596   :  { %v826_v1 = vadd.f32 %v1138_v63, %v975_v57  ;;  %v820_v2 = vpop.f32.mrb[11].mxu0 }
 0x597   :  { %v821_v3 = vadd.f32 %v975_v57, %v820_v2  ;;  %1155 = vmatprep.mubr.msk.f32.mxu1 %vm731_vm2, %v829_v62 }
 0x598   :  { %1156 = vmatmul.mubr.msk.f32.vlgmr.msra.gmra.mrb[8].mxu1 %vm731_vm2, %v830_v0  ;;  %v832_v5 = vmax.f32 %v826_v1, 0.0 }
 0x599   :  { %v831_v4 = vmax.f32 %v821_v3, 0.0 }
 0x59b   :  { %1158 = vmatprep.mubr.msk.f32.mxu1 %vm731_vm2, %v831_v4 }
 0x59c   :  { %1159 = vmatmul.mubr.msk.f32.gmra.mrb[10].mxu1 %vm731_vm2, %v832_v5 }
 0x66b   :  { %v1157_v7 = vpop.f32.mrb[8].mxu1 }
 0x66c   :  { %v932_v8 = vadd.f32 %v1157_v7, %v980_v6  ;;  %v926_v9 = vpop.f32.mrb[9].mxu1 }
 0x66d   :  { %v927_v10 = vadd.f32 %v980_v6, %v926_v9 }
 0x66e   :  { %947 = vst.msk [vmem:[%s1734_s16 + $0x8] sm:$0xff] %vm945_vm3, %v932_v8 }
 0x66f   :  { %946 = vst.msk [vmem:[%s1734_s16] sm:$0xff] %vm945_vm3, %v927_v10  ;;  %v1160_v11 = vpop.f32.mrb[10].mxu1 }
 0x670   :  { %v942_v12 = vadd.f32 %v1160_v11, %v980_v6  ;;  %v936_v13 = vpop.f32.mrb[11].mxu1 }
 0x671   :  { %v937_v14 = vadd.f32 %v980_v6, %v936_v13 }
 0x672   :  { %949 = vst.msk [vmem:[%s1734_s16 + $0x18] sm:$0xff] %vm945_vm3, %v942_v12 }
 0x673   :  { %948 = vst.msk [vmem:[%s1734_s16 + $0x10] sm:$0xff] %vm945_vm3, %v937_v14 }
 0x674   :  { %954 = vsyncpa [#allocation3], 1 }
 0x675   :  { %955 = vsyncpa [#allocation5], 1 }
 0x676   :  { %956 = vsyncpa [#allocation8], 1 }
 0x677   :  { %957 = vsyncpa [#allocation11], 1 }

</bundles_post_ra>
